<compile_context>
chip_gen: v7x
topology: tpu7x:2x2x1
jax: 0.10.0
libtpu: 0.0.40
codegen_flags: <defaults>
</compile_context>

<pallas_src>
import math

import jax
import jax.numpy as jnp
from jax.experimental import pallas as pl
from jax.experimental.pallas import tpu as pltpu


def _residual_block_kernel(x_main_ref, x_top_ref, x_bot_ref,
                           w1_ref, b1_ref, w2_ref, b2_ref,
                           o_ref, xbuf_ref, mid_ref):
    # Per grid step (batch element n, H-strip s starting at image row r0):
    #   x_main_ref: (1, Sh, W, Cin) f32   image rows [r0, r0+Sh)
    #   x_top_ref : (1, 2,  W, Cin) f32   image rows [r0-2, r0)      (clamped)
    #   x_bot_ref : (1, 2,  W, Cin) f32   image rows [r0+Sh, r0+Sh+2) (clamped)
    #   w1_ref    : (9, Cin,  Cmid) bf16  per-tap conv1 weights, tap = dy*3+dx
    #   w2_ref    : (9, Cmid, Cout) bf16
    #   b1_ref    : (1, Cmid) f32,  b2_ref: (1, Cout) f32
    #   o_ref     : (1, Sh, W, Cout) f32
    #   xbuf_ref  : (Sh+4, W+2, Cin)  f32 scratch: zero-padded input window
    #   mid_ref   : (Sh+2, W+2, Cmid) f32 scratch: zero-padded relu(conv1) window
    f32 = jnp.float32
    bf16 = jnp.bfloat16
    Sh = o_ref.shape[1]
    W = o_ref.shape[2]
    Cin = x_main_ref.shape[3]
    Cmid = mid_ref.shape[2]
    Cout = o_ref.shape[3]
    R = Sh + 2                       # intermediate rows needed by conv2

    s = pl.program_id(1)
    last = pl.num_programs(1) - 1

    # ---- assemble the zero-padded (halo'd) input window in VMEM -----------
    # Column halo (always zero: conv padding in W).
    xbuf_ref[:, 0:1, :] = jnp.zeros((Sh + 4, 1, Cin), f32)
    xbuf_ref[:, W + 1:W + 2, :] = jnp.zeros((Sh + 4, 1, Cin), f32)
    # Strip body.
    xbuf_ref[2:Sh + 2, 1:W + 1, :] = x_main_ref[0]

    # Top 2-row halo: neighbour rows, or zeros at the image boundary.
    @pl.when(s == 0)
    def _():
        xbuf_ref[0:2, 1:W + 1, :] = jnp.zeros((2, W, Cin), f32)

    @pl.when(s > 0)
    def _():
        xbuf_ref[0:2, 1:W + 1, :] = x_top_ref[0]

    # Bottom 2-row halo.
    @pl.when(s == last)
    def _():
        xbuf_ref[Sh + 2:Sh + 4, 1:W + 1, :] = jnp.zeros((2, W, Cin), f32)

    @pl.when(s < last)
    def _():
        xbuf_ref[Sh + 2:Sh + 4, 1:W + 1, :] = x_bot_ref[0]

    # ---- conv1: 9 shifted-tap MXU matmuls (bf16 in, f32 accumulate) -------
    # Computes the intermediate for rows [r0-1, r0+Sh+1) (conv2 needs a 1-row
    # halo of the intermediate).
    acc1 = jnp.zeros((R * W, Cmid), f32)
    for t in range(9):
        dy, dx = divmod(t, 3)
        tap = xbuf_ref[dy:dy + R, dx:dx + W, :].reshape(R * W, Cin).astype(bf16)
        acc1 = acc1 + jnp.dot(tap, w1_ref[t], preferred_element_type=f32)
    h = jnp.maximum(acc1 + b1_ref[...], 0.0)            # bias + ReLU (f32)

    # ---- zero-padded intermediate window in VMEM ---------------------------
    mid_ref[:, 0:1, :] = jnp.zeros((R, 1, Cmid), f32)
    mid_ref[:, W + 1:W + 2, :] = jnp.zeros((R, 1, Cmid), f32)
    mid_ref[:, 1:W + 1, :] = h.reshape(R, W, Cmid)
    # conv2's zero padding at the image top/bottom replaces the (meaningless)
    # conv1 values computed for out-of-image rows.
    @pl.when(s == 0)
    def _():
        mid_ref[0:1, :, :] = jnp.zeros((1, W + 2, Cmid), f32)

    @pl.when(s == last)
    def _():
        mid_ref[R - 1:R, :, :] = jnp.zeros((1, W + 2, Cmid), f32)

    # ---- conv2: 9 shifted-tap MXU matmuls ----------------------------------
    acc2 = jnp.zeros((Sh * W, Cout), f32)
    for t in range(9):
        dy, dx = divmod(t, 3)
        tap = mid_ref[dy:dy + Sh, dx:dx + W, :].reshape(Sh * W, Cmid).astype(bf16)
        acc2 = acc2 + jnp.dot(tap, w2_ref[t], preferred_element_type=f32)

    # ---- bias + residual (f32, from the aligned main strip) + final ReLU ---
    resid = x_main_ref[0]
    out = jnp.maximum(acc2.reshape(Sh, W, Cout) + b2_ref[...] + resid, 0.0)
    o_ref[0] = out.astype(o_ref.dtype)


def _vmem_tile_bytes(shape, dtype):
    """Rough VMEM footprint of one buffer (last two dims padded to TPU tiles)."""
    itemsize = jnp.dtype(dtype).itemsize
    sublane = {4: 8, 2: 16, 1: 32}.get(itemsize, 8)
    dims = list(shape)
    dims[-1] = -(-dims[-1] // 128) * 128
    if len(dims) >= 2:
        dims[-2] = -(-dims[-2] // sublane) * sublane
    return math.prod(dims) * itemsize


def residual_block(x, w1, b1, w2, b2, strip_h=None):
    """CARN ResidualBlock forward.

    x      : (N, H, W, C) float32, NHWC.
    w1, w2 : (3, 3, Cin, Cout) float32, HWIO (= torch (O,I,3,3).transpose(2,3,1,0)).
    b1, b2 : (Cout,) float32.
    """
    N, H, W, C = x.shape
    kh, kw, Cin, Cmid = w1.shape
    Cout = w2.shape[3]
    assert (kh, kw) == (3, 3) and Cin == C and w2.shape[:2] == (3, 3)
    assert w2.shape[2] == Cmid
    assert Cout == C, "residual add requires out_channels == in_channels"
    assert H % 2 == 0, "2-row halo blocks require an even H"

    if strip_h is None:
        strip_h = H
        for cand in (32, 16, 8):
            if H % cand == 0 and H // cand >= 2:
                strip_h = cand
                break
    assert H % strip_h == 0 and strip_h % 2 == 0
    ns = H // strip_h
    hb = strip_h // 2            # strip height measured in 2-row halo blocks
    n_hblk = H // 2              # number of 2-row blocks along H

    # Per-tap weights pre-cast to bf16 for the MXU (f32 accumulation in-kernel).
    w1_t = w1.reshape(9, Cin, Cmid).astype(jnp.bfloat16)
    w2_t = w2.reshape(9, Cmid, Cout).astype(jnp.bfloat16)
    b1r = b1.reshape(1, Cmid).astype(jnp.float32)
    b2r = b2.reshape(1, Cout).astype(jnp.float32)

    # Input strips: the main strip plus two small clamped 2-row halo blocks
    # (x is passed three times with different BlockSpecs; no wrapper jnp.pad).
    main_spec = pl.BlockSpec((1, strip_h, W, Cin), lambda n, s: (n, s, 0, 0))
    top_spec = pl.BlockSpec(
        (1, 2, W, Cin), lambda n, s: (n, jnp.maximum(s * hb - 1, 0), 0, 0))
    bot_spec = pl.BlockSpec(
        (1, 2, W, Cin),
        lambda n, s: (n, jnp.minimum((s + 1) * hb, n_hblk - 1), 0, 0))

    f32, bf16 = jnp.float32, jnp.bfloat16
    est = (2 * (_vmem_tile_bytes((1, strip_h, W, Cin), f32)
                + 2 * _vmem_tile_bytes((1, 2, W, Cin), f32)
                + _vmem_tile_bytes((9, Cin, Cmid), bf16)
                + _vmem_tile_bytes((9, Cmid, Cout), bf16)
                + _vmem_tile_bytes((1, Cmid), f32)
                + _vmem_tile_bytes((1, Cout), f32)
                + _vmem_tile_bytes((1, strip_h, W, Cout), f32))
           + _vmem_tile_bytes((strip_h + 4, W + 2, Cin), f32)
           + _vmem_tile_bytes((strip_h + 2, W + 2, Cmid), f32))
    vmem_limit = min(max(2 * est + (1 << 20), 4 << 20), 48 << 20)

    return pl.pallas_call(
        _residual_block_kernel,
        out_shape=jax.ShapeDtypeStruct((N, H, W, Cout), x.dtype),
        grid_spec=pltpu.PrefetchScalarGridSpec(
            num_scalar_prefetch=0,
            grid=(N, ns),
            in_specs=[
                main_spec,
                top_spec,
                bot_spec,
                pl.BlockSpec((9, Cin, Cmid), lambda n, s: (0, 0, 0)),
                pl.BlockSpec((1, Cmid), lambda n, s: (0, 0)),
                pl.BlockSpec((9, Cmid, Cout), lambda n, s: (0, 0, 0)),
                pl.BlockSpec((1, Cout), lambda n, s: (0, 0)),
            ],
            out_specs=pl.BlockSpec((1, strip_h, W, Cout),
                                   lambda n, s: (n, s, 0, 0)),
            scratch_shapes=[
                pltpu.VMEM((strip_h + 4, W + 2, Cin), jnp.float32),   # padded x window
                pltpu.VMEM((strip_h + 2, W + 2, Cmid), jnp.float32),  # padded mid window
            ],
        ),
        compiler_params=pltpu.CompilerParams(
            dimension_semantics=("parallel", "parallel"),
            vmem_limit_bytes=vmem_limit,
        ),
    )(x, x, x, w1_t, b1r, w2_t, b2r)


def residual_block_reference(x, w1, b1, w2, b2):
    """Plain-JAX reference (matches PyTorch semantics, NHWC layout, f32)."""
    dn = ("NHWC", "HWIO", "NHWC")
    y = jax.lax.conv_general_dilated(x, w1, (1, 1), ((1, 1), (1, 1)),
                                     dimension_numbers=dn)
    y = jax.nn.relu(y + b1)
    y = jax.lax.conv_general_dilated(y, w2, (1, 1), ((1, 1), (1, 1)),
                                     dimension_numbers=dn)
    return jax.nn.relu(y + b2 + x)


if __name__ == "__main__":
    N, H, W, C = 2, 16, 16, 4        # in_channels = out_channels = 4

    key = jax.random.PRNGKey(0)
    k_x, k_w1, k_b1, k_w2, k_b2 = jax.random.split(key, 5)

    x = jax.random.normal(k_x, (N, H, W, C), dtype=jnp.float32)
    # Conv weights in HWIO (torch Conv2d weight (O, I, 3, 3) transposed).
    w1 = 0.1 * jax.random.normal(k_w1, (3, 3, C, C), dtype=jnp.float32)
    b1 = 0.1 * jax.random.normal(k_b1, (C,), dtype=jnp.float32)
    w2 = 0.1 * jax.random.normal(k_w2, (3, 3, C, C), dtype=jnp.float32)
    b2 = 0.1 * jax.random.normal(k_b2, (C,), dtype=jnp.float32)

    # strip_h=4 -> 4 strips per image: exercises both the boundary-halo and
    # interior-halo code paths as well as the 2-D (batch, strip) grid.
    out = residual_block(x, w1, b1, w2, b2, strip_h=4)
    out = jax.block_until_ready(out)

    ref = residual_block_reference(x, w1, b1, w2, b2)
    assert out.shape == (N, H, W, C)
    # Tolerance loosened vs the f32 reference because the MXU is fed bf16
    # operands (accumulation is f32), per the performance review.
    err = float(jnp.max(jnp.abs(out - ref)))
    assert jnp.allclose(out, ref, atol=3e-2, rtol=3e-2), f"mismatch, max err {err}"

    print("KERNEL_OK")
</pallas_src>

<mosaic_0001>
module attributes {stable_mosaic.version = 11 : i64} {
  func.func @_residual_block_kernel(%arg0: i32, %arg1: i32, %arg2: memref<1x4x16x4xf32, #tpu.memory_space<vmem>>, %arg3: memref<1x2x16x4xf32, #tpu.memory_space<vmem>>, %arg4: memref<1x2x16x4xf32, #tpu.memory_space<vmem>>, %arg5: memref<9x4x4xbf16, #tpu.memory_space<vmem>>, %arg6: memref<1x4xf32, #tpu.memory_space<vmem>>, %arg7: memref<9x4x4xbf16, #tpu.memory_space<vmem>>, %arg8: memref<1x4xf32, #tpu.memory_space<vmem>>, %arg9: memref<1x4x16x4xf32, #tpu.memory_space<vmem>>, %arg10: memref<8x18x4xf32, #tpu.memory_space<vmem>>, %arg11: memref<6x18x4xf32, #tpu.memory_space<vmem>>) attributes {dimension_semantics = [#tpu.dimension_semantics<parallel>, #tpu.dimension_semantics<parallel>], iteration_bounds = array<i64: 2, 4>, scalar_prefetch = 0 : i64, scratch_operands = 2 : i64, tpu.core_type = #tpu.core_type<tc>, window_params = [{transform_indices = @transform_0, window_bounds = array<i64: 1, 4, 16, 4>}, {transform_indices = @transform_1, window_bounds = array<i64: 1, 2, 16, 4>}, {transform_indices = @transform_2, window_bounds = array<i64: 1, 2, 16, 4>}, {pipeline_mode = #tpu.pipeline_mode<synchronous>, transform_indices = @transform_3, window_bounds = array<i64: 9, 4, 4>}, {pipeline_mode = #tpu.pipeline_mode<synchronous>, transform_indices = @transform_4, window_bounds = array<i64: 1, 4>}, {pipeline_mode = #tpu.pipeline_mode<synchronous>, transform_indices = @transform_5, window_bounds = array<i64: 9, 4, 4>}, {pipeline_mode = #tpu.pipeline_mode<synchronous>, transform_indices = @transform_6, window_bounds = array<i64: 1, 4>}, {transform_indices = @transform_7, window_bounds = array<i64: 1, 4, 16, 4>}]} {
    %cst = arith.constant 0.000000e+00 : f32
    %0 = vector.broadcast %cst : f32 to vector<8x1x4xf32>
    %c0 = arith.constant 0 : index
    %c0_0 = arith.constant 0 : index
    %c0_1 = arith.constant 0 : index
    %1 = vector.load %arg10[%c0, %c0_0, %c0_1] : memref<8x18x4xf32, #tpu.memory_space<vmem>>, vector<8x1x4xf32>
    tpu.vector_store %arg10[%c0, %c0_0, %c0_1], %0 {strides = array<i32>} : memref<8x18x4xf32, #tpu.memory_space<vmem>>, vector<8x1x4xf32>,
    %cst_2 = arith.constant 0.000000e+00 : f32
    %2 = vector.broadcast %cst_2 : f32 to vector<8x1x4xf32>
    %c0_3 = arith.constant 0 : index
    %c17 = arith.constant 17 : index
    %c0_4 = arith.constant 0 : index
    %3 = vector.load %arg10[%c0_3, %c17, %c0_4] : memref<8x18x4xf32, #tpu.memory_space<vmem>>, vector<8x1x4xf32>
    tpu.vector_store %arg10[%c0_3, %c17, %c0_4], %2 {strides = array<i32>} : memref<8x18x4xf32, #tpu.memory_space<vmem>>, vector<8x1x4xf32>,
    %c0_5 = arith.constant 0 : index
    %c0_6 = arith.constant 0 : index
    %c0_7 = arith.constant 0 : index
    %c0_8 = arith.constant 0 : index
    %4 = vector.load %arg2[%c0_5, %c0_6, %c0_7, %c0_8] : memref<1x4x16x4xf32, #tpu.memory_space<vmem>>, vector<1x4x16x4xf32>
    %5 = vector.shape_cast %4 : vector<1x4x16x4xf32> to vector<4x16x4xf32>
    %c2 = arith.constant 2 : index
    %c1 = arith.constant 1 : index
    %c0_9 = arith.constant 0 : index
    %6 = vector.load %arg10[%c2, %c1, %c0_9] : memref<8x18x4xf32, #tpu.memory_space<vmem>>, vector<4x16x4xf32>
    tpu.vector_store %arg10[%c2, %c1, %c0_9], %5 {strides = array<i32>} : memref<8x18x4xf32, #tpu.memory_space<vmem>>, vector<4x16x4xf32>,
    %c0_i32 = arith.constant 0 : i32
    %7 = arith.cmpi eq, %arg1, %c0_i32 : i32
    %8 = arith.extui %7 : i1 to i32
    %c0_i32_10 = arith.constant 0 : i32
    %9 = arith.cmpi ne, %8, %c0_i32_10 : i32
    scf.if %9 {
      %cst_167 = arith.constant 0.000000e+00 : f32
      %177 = vector.broadcast %cst_167 : f32 to vector<2x16x4xf32>
      %c0_168 = arith.constant 0 : index
      %c1_169 = arith.constant 1 : index
      %c0_170 = arith.constant 0 : index
      %178 = vector.load %arg10[%c0_168, %c1_169, %c0_170] : memref<8x18x4xf32, #tpu.memory_space<vmem>>, vector<2x16x4xf32>
      tpu.vector_store %arg10[%c0_168, %c1_169, %c0_170], %177 {strides = array<i32>} : memref<8x18x4xf32, #tpu.memory_space<vmem>>, vector<2x16x4xf32>,
    } else {
    }
    %c0_i32_11 = arith.constant 0 : i32
    %10 = arith.cmpi sgt, %arg1, %c0_i32_11 : i32
    %11 = arith.extui %10 : i1 to i32
    %c0_i32_12 = arith.constant 0 : i32
    %12 = arith.cmpi ne, %11, %c0_i32_12 : i32
    scf.if %12 {
      %c0_167 = arith.constant 0 : index
      %c0_168 = arith.constant 0 : index
      %c0_169 = arith.constant 0 : index
      %c0_170 = arith.constant 0 : index
      %177 = vector.load %arg3[%c0_167, %c0_168, %c0_169, %c0_170] : memref<1x2x16x4xf32, #tpu.memory_space<vmem>>, vector<1x2x16x4xf32>
      %178 = vector.shape_cast %177 : vector<1x2x16x4xf32> to vector<2x16x4xf32>
      %c0_171 = arith.constant 0 : index
      %c1_172 = arith.constant 1 : index
      %c0_173 = arith.constant 0 : index
      %179 = vector.load %arg10[%c0_171, %c1_172, %c0_173] : memref<8x18x4xf32, #tpu.memory_space<vmem>>, vector<2x16x4xf32>
      tpu.vector_store %arg10[%c0_171, %c1_172, %c0_173], %178 {strides = array<i32>} : memref<8x18x4xf32, #tpu.memory_space<vmem>>, vector<2x16x4xf32>,
    } else {
    }
    %c3_i32 = arith.constant 3 : i32
    %13 = arith.cmpi eq, %arg1, %c3_i32 : i32
    %14 = arith.extui %13 : i1 to i32
    %c0_i32_13 = arith.constant 0 : i32
    %15 = arith.cmpi ne, %14, %c0_i32_13 : i32
    scf.if %15 {
      %cst_167 = arith.constant 0.000000e+00 : f32
      %177 = vector.broadcast %cst_167 : f32 to vector<2x16x4xf32>
      %c6_168 = arith.constant 6 : index
      %c1_169 = arith.constant 1 : index
      %c0_170 = arith.constant 0 : index
      %178 = vector.load %arg10[%c6_168, %c1_169, %c0_170] : memref<8x18x4xf32, #tpu.memory_space<vmem>>, vector<2x16x4xf32>
      tpu.vector_store %arg10[%c6_168, %c1_169, %c0_170], %177 {strides = array<i32>} : memref<8x18x4xf32, #tpu.memory_space<vmem>>, vector<2x16x4xf32>,
    } else {
    }
    %c3_i32_14 = arith.constant 3 : i32
    %16 = arith.cmpi slt, %arg1, %c3_i32_14 : i32
    %17 = arith.extui %16 : i1 to i32
    %c0_i32_15 = arith.constant 0 : i32
    %18 = arith.cmpi ne, %17, %c0_i32_15 : i32
    scf.if %18 {
      %c0_167 = arith.constant 0 : index
      %c0_168 = arith.constant 0 : index
      %c0_169 = arith.constant 0 : index
      %c0_170 = arith.constant 0 : index
      %177 = vector.load %arg4[%c0_167, %c0_168, %c0_169, %c0_170] : memref<1x2x16x4xf32, #tpu.memory_space<vmem>>, vector<1x2x16x4xf32>
      %178 = vector.shape_cast %177 : vector<1x2x16x4xf32> to vector<2x16x4xf32>
      %c6_171 = arith.constant 6 : index
      %c1_172 = arith.constant 1 : index
      %c0_173 = arith.constant 0 : index
      %179 = vector.load %arg10[%c6_171, %c1_172, %c0_173] : memref<8x18x4xf32, #tpu.memory_space<vmem>>, vector<2x16x4xf32>
      tpu.vector_store %arg10[%c6_171, %c1_172, %c0_173], %178 {strides = array<i32>} : memref<8x18x4xf32, #tpu.memory_space<vmem>>, vector<2x16x4xf32>,
    } else {
    }
    %cst_16 = arith.constant 0.000000e+00 : f32
    %19 = vector.broadcast %cst_16 : f32 to vector<96x4xf32>
    %c0_17 = arith.constant 0 : index
    %c0_18 = arith.constant 0 : index
    %c0_19 = arith.constant 0 : index
    %20 = vector.load %arg10[%c0_17, %c0_18, %c0_19] : memref<8x18x4xf32, #tpu.memory_space<vmem>>, vector<6x16x4xf32>
    %21 = vector.shape_cast %20 : vector<6x16x4xf32> to vector<96x4xf32>
    %22 = arith.truncf %21 : vector<96x4xf32> to vector<96x4xbf16>
    %c0_20 = arith.constant 0 : index
    %c0_21 = arith.constant 0 : index
    %c0_22 = arith.constant 0 : index
    %23 = vector.load %arg5[%c0_20, %c0_21, %c0_22] : memref<9x4x4xbf16, #tpu.memory_space<vmem>>, vector<1x4x4xbf16>
    %24 = vector.shape_cast %23 : vector<1x4x4xbf16> to vector<4x4xbf16>
    %cst_23 = arith.constant dense<0.000000e+00> : vector<96x4xf32>
    %25 = tpu.matmul %22, %24, %cst_23 {dimension_numbers = #tpu.dot_dimension_numbers<[1], [0], [0], [1], [0, 0, 1, 1], [], []>} : vector<96x4xbf16>, vector<4x4xbf16>, vector<96x4xf32> -> vector<96x4xf32>
    %26 = arith.addf %19, %25 : vector<96x4xf32>
    %c0_24 = arith.constant 0 : index
    %c1_25 = arith.constant 1 : index
    %c0_26 = arith.constant 0 : index
    %27 = vector.load %arg10[%c0_24, %c1_25, %c0_26] : memref<8x18x4xf32, #tpu.memory_space<vmem>>, vector<6x16x4xf32>
    %28 = vector.shape_cast %27 : vector<6x16x4xf32> to vector<96x4xf32>
    %29 = arith.truncf %28 : vector<96x4xf32> to vector<96x4xbf16>
    %c1_27 = arith.constant 1 : index
    %c0_28 = arith.constant 0 : index
    %c0_29 = arith.constant 0 : index
    %30 = vector.load %arg5[%c1_27, %c0_28, %c0_29] : memref<9x4x4xbf16, #tpu.memory_space<vmem>>, vector<1x4x4xbf16>
    %31 = vector.shape_cast %30 : vector<1x4x4xbf16> to vector<4x4xbf16>
    %cst_30 = arith.constant dense<0.000000e+00> : vector<96x4xf32>
    %32 = tpu.matmul %29, %31, %cst_30 {dimension_numbers = #tpu.dot_dimension_numbers<[1], [0], [0], [1], [0, 0, 1, 1], [], []>} : vector<96x4xbf16>, vector<4x4xbf16>, vector<96x4xf32> -> vector<96x4xf32>
    %33 = arith.addf %26, %32 : vector<96x4xf32>
    %c0_31 = arith.constant 0 : index
    %c2_32 = arith.constant 2 : index
    %c0_33 = arith.constant 0 : index
    %34 = vector.load %arg10[%c0_31, %c2_32, %c0_33] : memref<8x18x4xf32, #tpu.memory_space<vmem>>, vector<6x16x4xf32>
    %35 = vector.shape_cast %34 : vector<6x16x4xf32> to vector<96x4xf32>
    %36 = arith.truncf %35 : vector<96x4xf32> to vector<96x4xbf16>
    %c2_34 = arith.constant 2 : index
    %c0_35 = arith.constant 0 : index
    %c0_36 = arith.constant 0 : index
    %37 = vector.load %arg5[%c2_34, %c0_35, %c0_36] : memref<9x4x4xbf16, #tpu.memory_space<vmem>>, vector<1x4x4xbf16>
    %38 = vector.shape_cast %37 : vector<1x4x4xbf16> to vector<4x4xbf16>
    %cst_37 = arith.constant dense<0.000000e+00> : vector<96x4xf32>
    %39 = tpu.matmul %36, %38, %cst_37 {dimension_numbers = #tpu.dot_dimension_numbers<[1], [0], [0], [1], [0, 0, 1, 1], [], []>} : vector<96x4xbf16>, vector<4x4xbf16>, vector<96x4xf32> -> vector<96x4xf32>
    %40 = arith.addf %33, %39 : vector<96x4xf32>
    %c1_38 = arith.constant 1 : index
    %c0_39 = arith.constant 0 : index
    %c0_40 = arith.constant 0 : index
    %41 = vector.load %arg10[%c1_38, %c0_39, %c0_40] : memref<8x18x4xf32, #tpu.memory_space<vmem>>, vector<6x16x4xf32>
    %42 = vector.shape_cast %41 : vector<6x16x4xf32> to vector<96x4xf32>
    %43 = arith.truncf %42 : vector<96x4xf32> to vector<96x4xbf16>
    %c3 = arith.constant 3 : index
    %c0_41 = arith.constant 0 : index
    %c0_42 = arith.constant 0 : index
    %44 = vector.load %arg5[%c3, %c0_41, %c0_42] : memref<9x4x4xbf16, #tpu.memory_space<vmem>>, vector<1x4x4xbf16>
    %45 = vector.shape_cast %44 : vector<1x4x4xbf16> to vector<4x4xbf16>
    %cst_43 = arith.constant dense<0.000000e+00> : vector<96x4xf32>
    %46 = tpu.matmul %43, %45, %cst_43 {dimension_numbers = #tpu.dot_dimension_numbers<[1], [0], [0], [1], [0, 0, 1, 1], [], []>} : vector<96x4xbf16>, vector<4x4xbf16>, vector<96x4xf32> -> vector<96x4xf32>
    %47 = arith.addf %40, %46 : vector<96x4xf32>
    %c1_44 = arith.constant 1 : index
    %c1_45 = arith.constant 1 : index
    %c0_46 = arith.constant 0 : index
    %48 = vector.load %arg10[%c1_44, %c1_45, %c0_46] : memref<8x18x4xf32, #tpu.memory_space<vmem>>, vector<6x16x4xf32>
    %49 = vector.shape_cast %48 : vector<6x16x4xf32> to vector<96x4xf32>
    %50 = arith.truncf %49 : vector<96x4xf32> to vector<96x4xbf16>
    %c4 = arith.constant 4 : index
    %c0_47 = arith.constant 0 : index
    %c0_48 = arith.constant 0 : index
    %51 = vector.load %arg5[%c4, %c0_47, %c0_48] : memref<9x4x4xbf16, #tpu.memory_space<vmem>>, vector<1x4x4xbf16>
    %52 = vector.shape_cast %51 : vector<1x4x4xbf16> to vector<4x4xbf16>
    %cst_49 = arith.constant dense<0.000000e+00> : vector<96x4xf32>
    %53 = tpu.matmul %50, %52, %cst_49 {dimension_numbers = #tpu.dot_dimension_numbers<[1], [0], [0], [1], [0, 0, 1, 1], [], []>} : vector<96x4xbf16>, vector<4x4xbf16>, vector<96x4xf32> -> vector<96x4xf32>
    %54 = arith.addf %47, %53 : vector<96x4xf32>
    %c1_50 = arith.constant 1 : index
    %c2_51 = arith.constant 2 : index
    %c0_52 = arith.constant 0 : index
    %55 = vector.load %arg10[%c1_50, %c2_51, %c0_52] : memref<8x18x4xf32, #tpu.memory_space<vmem>>, vector<6x16x4xf32>
    %56 = vector.shape_cast %55 : vector<6x16x4xf32> to vector<96x4xf32>
    %57 = arith.truncf %56 : vector<96x4xf32> to vector<96x4xbf16>
    %c5 = arith.constant 5 : index
    %c0_53 = arith.constant 0 : index
    %c0_54 = arith.constant 0 : index
    %58 = vector.load %arg5[%c5, %c0_53, %c0_54] : memref<9x4x4xbf16, #tpu.memory_space<vmem>>, vector<1x4x4xbf16>
    %59 = vector.shape_cast %58 : vector<1x4x4xbf16> to vector<4x4xbf16>
    %cst_55 = arith.constant dense<0.000000e+00> : vector<96x4xf32>
    %60 = tpu.matmul %57, %59, %cst_55 {dimension_numbers = #tpu.dot_dimension_numbers<[1], [0], [0], [1], [0, 0, 1, 1], [], []>} : vector<96x4xbf16>, vector<4x4xbf16>, vector<96x4xf32> -> vector<96x4xf32>
    %61 = arith.addf %54, %60 : vector<96x4xf32>
    %c2_56 = arith.constant 2 : index
    %c0_57 = arith.constant 0 : index
    %c0_58 = arith.constant 0 : index
    %62 = vector.load %arg10[%c2_56, %c0_57, %c0_58] : memref<8x18x4xf32, #tpu.memory_space<vmem>>, vector<6x16x4xf32>
    %63 = vector.shape_cast %62 : vector<6x16x4xf32> to vector<96x4xf32>
    %64 = arith.truncf %63 : vector<96x4xf32> to vector<96x4xbf16>
    %c6 = arith.constant 6 : index
    %c0_59 = arith.constant 0 : index
    %c0_60 = arith.constant 0 : index
    %65 = vector.load %arg5[%c6, %c0_59, %c0_60] : memref<9x4x4xbf16, #tpu.memory_space<vmem>>, vector<1x4x4xbf16>
    %66 = vector.shape_cast %65 : vector<1x4x4xbf16> to vector<4x4xbf16>
    %cst_61 = arith.constant dense<0.000000e+00> : vector<96x4xf32>
    %67 = tpu.matmul %64, %66, %cst_61 {dimension_numbers = #tpu.dot_dimension_numbers<[1], [0], [0], [1], [0, 0, 1, 1], [], []>} : vector<96x4xbf16>, vector<4x4xbf16>, vector<96x4xf32> -> vector<96x4xf32>
    %68 = arith.addf %61, %67 : vector<96x4xf32>
    %c2_62 = arith.constant 2 : index
    %c1_63 = arith.constant 1 : index
    %c0_64 = arith.constant 0 : index
    %69 = vector.load %arg10[%c2_62, %c1_63, %c0_64] : memref<8x18x4xf32, #tpu.memory_space<vmem>>, vector<6x16x4xf32>
    %70 = vector.shape_cast %69 : vector<6x16x4xf32> to vector<96x4xf32>
    %71 = arith.truncf %70 : vector<96x4xf32> to vector<96x4xbf16>
    %c7 = arith.constant 7 : index
    %c0_65 = arith.constant 0 : index
    %c0_66 = arith.constant 0 : index
    %72 = vector.load %arg5[%c7, %c0_65, %c0_66] : memref<9x4x4xbf16, #tpu.memory_space<vmem>>, vector<1x4x4xbf16>
    %73 = vector.shape_cast %72 : vector<1x4x4xbf16> to vector<4x4xbf16>
    %cst_67 = arith.constant dense<0.000000e+00> : vector<96x4xf32>
    %74 = tpu.matmul %71, %73, %cst_67 {dimension_numbers = #tpu.dot_dimension_numbers<[1], [0], [0], [1], [0, 0, 1, 1], [], []>} : vector<96x4xbf16>, vector<4x4xbf16>, vector<96x4xf32> -> vector<96x4xf32>
    %75 = arith.addf %68, %74 : vector<96x4xf32>
    %c2_68 = arith.constant 2 : index
    %c2_69 = arith.constant 2 : index
    %c0_70 = arith.constant 0 : index
    %76 = vector.load %arg10[%c2_68, %c2_69, %c0_70] : memref<8x18x4xf32, #tpu.memory_space<vmem>>, vector<6x16x4xf32>
    %77 = vector.shape_cast %76 : vector<6x16x4xf32> to vector<96x4xf32>
    %78 = arith.truncf %77 : vector<96x4xf32> to vector<96x4xbf16>
    %c8 = arith.constant 8 : index
    %c0_71 = arith.constant 0 : index
    %c0_72 = arith.constant 0 : index
    %79 = vector.load %arg5[%c8, %c0_71, %c0_72] : memref<9x4x4xbf16, #tpu.memory_space<vmem>>, vector<1x4x4xbf16>
    %80 = vector.shape_cast %79 : vector<1x4x4xbf16> to vector<4x4xbf16>
    %cst_73 = arith.constant dense<0.000000e+00> : vector<96x4xf32>
    %81 = tpu.matmul %78, %80, %cst_73 {dimension_numbers = #tpu.dot_dimension_numbers<[1], [0], [0], [1], [0, 0, 1, 1], [], []>} : vector<96x4xbf16>, vector<4x4xbf16>, vector<96x4xf32> -> vector<96x4xf32>
    %82 = arith.addf %75, %81 : vector<96x4xf32>
    %c0_74 = arith.constant 0 : index
    %c0_75 = arith.constant 0 : index
    %83 = vector.load %arg6[%c0_74, %c0_75] : memref<1x4xf32, #tpu.memory_space<vmem>>, vector<1x4xf32>
    %84 = vector.broadcast %83 : vector<1x4xf32> to vector<96x4xf32>
    %85 = arith.addf %82, %84 : vector<96x4xf32>
    %cst_76 = arith.constant 0.000000e+00 : f32
    %86 = vector.broadcast %cst_76 : f32 to vector<96x4xf32>
    %87 = arith.maximumf %85, %86 : vector<96x4xf32>
    %cst_77 = arith.constant 0.000000e+00 : f32
    %88 = vector.broadcast %cst_77 : f32 to vector<6x1x4xf32>
    %c0_78 = arith.constant 0 : index
    %c0_79 = arith.constant 0 : index
    %c0_80 = arith.constant 0 : index
    %89 = vector.load %arg11[%c0_78, %c0_79, %c0_80] : memref<6x18x4xf32, #tpu.memory_space<vmem>>, vector<6x1x4xf32>
    tpu.vector_store %arg11[%c0_78, %c0_79, %c0_80], %88 {strides = array<i32>} : memref<6x18x4xf32, #tpu.memory_space<vmem>>, vector<6x1x4xf32>,
    %cst_81 = arith.constant 0.000000e+00 : f32
    %90 = vector.broadcast %cst_81 : f32 to vector<6x1x4xf32>
    %c0_82 = arith.constant 0 : index
    %c17_83 = arith.constant 17 : index
    %c0_84 = arith.constant 0 : index
    %91 = vector.load %arg11[%c0_82, %c17_83, %c0_84] : memref<6x18x4xf32, #tpu.memory_space<vmem>>, vector<6x1x4xf32>
    tpu.vector_store %arg11[%c0_82, %c17_83, %c0_84], %90 {strides = array<i32>} : memref<6x18x4xf32, #tpu.memory_space<vmem>>, vector<6x1x4xf32>,
    %92 = vector.shape_cast %87 : vector<96x4xf32> to vector<6x16x4xf32>
    %c0_85 = arith.constant 0 : index
    %c1_86 = arith.constant 1 : index
    %c0_87 = arith.constant 0 : index
    %93 = vector.load %arg11[%c0_85, %c1_86, %c0_87] : memref<6x18x4xf32, #tpu.memory_space<vmem>>, vector<6x16x4xf32>
    tpu.vector_store %arg11[%c0_85, %c1_86, %c0_87], %92 {strides = array<i32>} : memref<6x18x4xf32, #tpu.memory_space<vmem>>, vector<6x16x4xf32>,
    %c0_i32_88 = arith.constant 0 : i32
    %94 = arith.cmpi eq, %arg1, %c0_i32_88 : i32
    %95 = arith.extui %94 : i1 to i32
    %c0_i32_89 = arith.constant 0 : i32
    %96 = arith.cmpi ne, %95, %c0_i32_89 : i32
    scf.if %96 {
      %cst_167 = arith.constant 0.000000e+00 : f32
      %177 = vector.broadcast %cst_167 : f32 to vector<1x18x4xf32>
      %c0_168 = arith.constant 0 : index
      %c0_169 = arith.constant 0 : index
      %c0_170 = arith.constant 0 : index
      %178 = vector.load %arg11[%c0_168, %c0_169, %c0_170] : memref<6x18x4xf32, #tpu.memory_space<vmem>>, vector<1x18x4xf32>
      tpu.vector_store %arg11[%c0_168, %c0_169, %c0_170], %177 {strides = array<i32>} : memref<6x18x4xf32, #tpu.memory_space<vmem>>, vector<1x18x4xf32>,
    } else {
    }
    %c3_i32_90 = arith.constant 3 : i32
    %97 = arith.cmpi eq, %arg1, %c3_i32_90 : i32
    %98 = arith.extui %97 : i1 to i32
    %c0_i32_91 = arith.constant 0 : i32
    %99 = arith.cmpi ne, %98, %c0_i32_91 : i32
    scf.if %99 {
      %cst_167 = arith.constant 0.000000e+00 : f32
      %177 = vector.broadcast %cst_167 : f32 to vector<1x18x4xf32>
      %c5_168 = arith.constant 5 : index
      %c0_169 = arith.constant 0 : index
      %c0_170 = arith.constant 0 : index
      %178 = vector.load %arg11[%c5_168, %c0_169, %c0_170] : memref<6x18x4xf32, #tpu.memory_space<vmem>>, vector<1x18x4xf32>
      tpu.vector_store %arg11[%c5_168, %c0_169, %c0_170], %177 {strides = array<i32>} : memref<6x18x4xf32, #tpu.memory_space<vmem>>, vector<1x18x4xf32>,
    } else {
    }
    %cst_92 = arith.constant 0.000000e+00 : f32
    %100 = vector.broadcast %cst_92 : f32 to vector<64x4xf32>
    %c0_93 = arith.constant 0 : index
    %c0_94 = arith.constant 0 : index
    %c0_95 = arith.constant 0 : index
    %101 = vector.load %arg11[%c0_93, %c0_94, %c0_95] : memref<6x18x4xf32, #tpu.memory_space<vmem>>, vector<4x16x4xf32>
    %102 = vector.shape_cast %101 : vector<4x16x4xf32> to vector<64x4xf32>
    %103 = arith.truncf %102 : vector<64x4xf32> to vector<64x4xbf16>
    %c0_96 = arith.constant 0 : index
    %c0_97 = arith.constant 0 : index
    %c0_98 = arith.constant 0 : index
    %104 = vector.load %arg7[%c0_96, %c0_97, %c0_98] : memref<9x4x4xbf16, #tpu.memory_space<vmem>>, vector<1x4x4xbf16>
    %105 = vector.shape_cast %104 : vector<1x4x4xbf16> to vector<4x4xbf16>
    %cst_99 = arith.constant dense<0.000000e+00> : vector<64x4xf32>
    %106 = tpu.matmul %103, %105, %cst_99 {dimension_numbers = #tpu.dot_dimension_numbers<[1], [0], [0], [1], [0, 0, 1, 1], [], []>} : vector<64x4xbf16>, vector<4x4xbf16>, vector<64x4xf32> -> vector<64x4xf32>
    %107 = arith.addf %100, %106 : vector<64x4xf32>
    %c0_100 = arith.constant 0 : index
    %c1_101 = arith.constant 1 : index
    %c0_102 = arith.constant 0 : index
    %108 = vector.load %arg11[%c0_100, %c1_101, %c0_102] : memref<6x18x4xf32, #tpu.memory_space<vmem>>, vector<4x16x4xf32>
    %109 = vector.shape_cast %108 : vector<4x16x4xf32> to vector<64x4xf32>
    %110 = arith.truncf %109 : vector<64x4xf32> to vector<64x4xbf16>
    %c1_103 = arith.constant 1 : index
    %c0_104 = arith.constant 0 : index
    %c0_105 = arith.constant 0 : index
    %111 = vector.load %arg7[%c1_103, %c0_104, %c0_105] : memref<9x4x4xbf16, #tpu.memory_space<vmem>>, vector<1x4x4xbf16>
    %112 = vector.shape_cast %111 : vector<1x4x4xbf16> to vector<4x4xbf16>
    %cst_106 = arith.constant dense<0.000000e+00> : vector<64x4xf32>
    %113 = tpu.matmul %110, %112, %cst_106 {dimension_numbers = #tpu.dot_dimension_numbers<[1], [0], [0], [1], [0, 0, 1, 1], [], []>} : vector<64x4xbf16>, vector<4x4xbf16>, vector<64x4xf32> -> vector<64x4xf32>
    %114 = arith.addf %107, %113 : vector<64x4xf32>
    %c0_107 = arith.constant 0 : index
    %c2_108 = arith.constant 2 : index
    %c0_109 = arith.constant 0 : index
    %115 = vector.load %arg11[%c0_107, %c2_108, %c0_109] : memref<6x18x4xf32, #tpu.memory_space<vmem>>, vector<4x16x4xf32>
    %116 = vector.shape_cast %115 : vector<4x16x4xf32> to vector<64x4xf32>
    %117 = arith.truncf %116 : vector<64x4xf32> to vector<64x4xbf16>
    %c2_110 = arith.constant 2 : index
    %c0_111 = arith.constant 0 : index
    %c0_112 = arith.constant 0 : index
    %118 = vector.load %arg7[%c2_110, %c0_111, %c0_112] : memref<9x4x4xbf16, #tpu.memory_space<vmem>>, vector<1x4x4xbf16>
    %119 = vector.shape_cast %118 : vector<1x4x4xbf16> to vector<4x4xbf16>
    %cst_113 = arith.constant dense<0.000000e+00> : vector<64x4xf32>
    %120 = tpu.matmul %117, %119, %cst_113 {dimension_numbers = #tpu.dot_dimension_numbers<[1], [0], [0], [1], [0, 0, 1, 1], [], []>} : vector<64x4xbf16>, vector<4x4xbf16>, vector<64x4xf32> -> vector<64x4xf32>
    %121 = arith.addf %114, %120 : vector<64x4xf32>
    %c1_114 = arith.constant 1 : index
    %c0_115 = arith.constant 0 : index
    %c0_116 = arith.constant 0 : index
    %122 = vector.load %arg11[%c1_114, %c0_115, %c0_116] : memref<6x18x4xf32, #tpu.memory_space<vmem>>, vector<4x16x4xf32>
    %123 = vector.shape_cast %122 : vector<4x16x4xf32> to vector<64x4xf32>
    %124 = arith.truncf %123 : vector<64x4xf32> to vector<64x4xbf16>
    %c3_117 = arith.constant 3 : index
    %c0_118 = arith.constant 0 : index
    %c0_119 = arith.constant 0 : index
    %125 = vector.load %arg7[%c3_117, %c0_118, %c0_119] : memref<9x4x4xbf16, #tpu.memory_space<vmem>>, vector<1x4x4xbf16>
    %126 = vector.shape_cast %125 : vector<1x4x4xbf16> to vector<4x4xbf16>
    %cst_120 = arith.constant dense<0.000000e+00> : vector<64x4xf32>
    %127 = tpu.matmul %124, %126, %cst_120 {dimension_numbers = #tpu.dot_dimension_numbers<[1], [0], [0], [1], [0, 0, 1, 1], [], []>} : vector<64x4xbf16>, vector<4x4xbf16>, vector<64x4xf32> -> vector<64x4xf32>
    %128 = arith.addf %121, %127 : vector<64x4xf32>
    %c1_121 = arith.constant 1 : index
    %c1_122 = arith.constant 1 : index
    %c0_123 = arith.constant 0 : index
    %129 = vector.load %arg11[%c1_121, %c1_122, %c0_123] : memref<6x18x4xf32, #tpu.memory_space<vmem>>, vector<4x16x4xf32>
    %130 = vector.shape_cast %129 : vector<4x16x4xf32> to vector<64x4xf32>
    %131 = arith.truncf %130 : vector<64x4xf32> to vector<64x4xbf16>
    %c4_124 = arith.constant 4 : index
    %c0_125 = arith.constant 0 : index
    %c0_126 = arith.constant 0 : index
    %132 = vector.load %arg7[%c4_124, %c0_125, %c0_126] : memref<9x4x4xbf16, #tpu.memory_space<vmem>>, vector<1x4x4xbf16>
    %133 = vector.shape_cast %132 : vector<1x4x4xbf16> to vector<4x4xbf16>
    %cst_127 = arith.constant dense<0.000000e+00> : vector<64x4xf32>
    %134 = tpu.matmul %131, %133, %cst_127 {dimension_numbers = #tpu.dot_dimension_numbers<[1], [0], [0], [1], [0, 0, 1, 1], [], []>} : vector<64x4xbf16>, vector<4x4xbf16>, vector<64x4xf32> -> vector<64x4xf32>
    %135 = arith.addf %128, %134 : vector<64x4xf32>
    %c1_128 = arith.constant 1 : index
    %c2_129 = arith.constant 2 : index
    %c0_130 = arith.constant 0 : index
    %136 = vector.load %arg11[%c1_128, %c2_129, %c0_130] : memref<6x18x4xf32, #tpu.memory_space<vmem>>, vector<4x16x4xf32>
    %137 = vector.shape_cast %136 : vector<4x16x4xf32> to vector<64x4xf32>
    %138 = arith.truncf %137 : vector<64x4xf32> to vector<64x4xbf16>
    %c5_131 = arith.constant 5 : index
    %c0_132 = arith.constant 0 : index
    %c0_133 = arith.constant 0 : index
    %139 = vector.load %arg7[%c5_131, %c0_132, %c0_133] : memref<9x4x4xbf16, #tpu.memory_space<vmem>>, vector<1x4x4xbf16>
    %140 = vector.shape_cast %139 : vector<1x4x4xbf16> to vector<4x4xbf16>
    %cst_134 = arith.constant dense<0.000000e+00> : vector<64x4xf32>
    %141 = tpu.matmul %138, %140, %cst_134 {dimension_numbers = #tpu.dot_dimension_numbers<[1], [0], [0], [1], [0, 0, 1, 1], [], []>} : vector<64x4xbf16>, vector<4x4xbf16>, vector<64x4xf32> -> vector<64x4xf32>
    %142 = arith.addf %135, %141 : vector<64x4xf32>
    %c2_135 = arith.constant 2 : index
    %c0_136 = arith.constant 0 : index
    %c0_137 = arith.constant 0 : index
    %143 = vector.load %arg11[%c2_135, %c0_136, %c0_137] : memref<6x18x4xf32, #tpu.memory_space<vmem>>, vector<4x16x4xf32>
    %144 = vector.shape_cast %143 : vector<4x16x4xf32> to vector<64x4xf32>
    %145 = arith.truncf %144 : vector<64x4xf32> to vector<64x4xbf16>
    %c6_138 = arith.constant 6 : index
    %c0_139 = arith.constant 0 : index
    %c0_140 = arith.constant 0 : index
    %146 = vector.load %arg7[%c6_138, %c0_139, %c0_140] : memref<9x4x4xbf16, #tpu.memory_space<vmem>>, vector<1x4x4xbf16>
    %147 = vector.shape_cast %146 : vector<1x4x4xbf16> to vector<4x4xbf16>
    %cst_141 = arith.constant dense<0.000000e+00> : vector<64x4xf32>
    %148 = tpu.matmul %145, %147, %cst_141 {dimension_numbers = #tpu.dot_dimension_numbers<[1], [0], [0], [1], [0, 0, 1, 1], [], []>} : vector<64x4xbf16>, vector<4x4xbf16>, vector<64x4xf32> -> vector<64x4xf32>
    %149 = arith.addf %142, %148 : vector<64x4xf32>
    %c2_142 = arith.constant 2 : index
    %c1_143 = arith.constant 1 : index
    %c0_144 = arith.constant 0 : index
    %150 = vector.load %arg11[%c2_142, %c1_143, %c0_144] : memref<6x18x4xf32, #tpu.memory_space<vmem>>, vector<4x16x4xf32>
    %151 = vector.shape_cast %150 : vector<4x16x4xf32> to vector<64x4xf32>
    %152 = arith.truncf %151 : vector<64x4xf32> to vector<64x4xbf16>
    %c7_145 = arith.constant 7 : index
    %c0_146 = arith.constant 0 : index
    %c0_147 = arith.constant 0 : index
    %153 = vector.load %arg7[%c7_145, %c0_146, %c0_147] : memref<9x4x4xbf16, #tpu.memory_space<vmem>>, vector<1x4x4xbf16>
    %154 = vector.shape_cast %153 : vector<1x4x4xbf16> to vector<4x4xbf16>
    %cst_148 = arith.constant dense<0.000000e+00> : vector<64x4xf32>
    %155 = tpu.matmul %152, %154, %cst_148 {dimension_numbers = #tpu.dot_dimension_numbers<[1], [0], [0], [1], [0, 0, 1, 1], [], []>} : vector<64x4xbf16>, vector<4x4xbf16>, vector<64x4xf32> -> vector<64x4xf32>
    %156 = arith.addf %149, %155 : vector<64x4xf32>
    %c2_149 = arith.constant 2 : index
    %c2_150 = arith.constant 2 : index
    %c0_151 = arith.constant 0 : index
    %157 = vector.load %arg11[%c2_149, %c2_150, %c0_151] : memref<6x18x4xf32, #tpu.memory_space<vmem>>, vector<4x16x4xf32>
    %158 = vector.shape_cast %157 : vector<4x16x4xf32> to vector<64x4xf32>
    %159 = arith.truncf %158 : vector<64x4xf32> to vector<64x4xbf16>
    %c8_152 = arith.constant 8 : index
    %c0_153 = arith.constant 0 : index
    %c0_154 = arith.constant 0 : index
    %160 = vector.load %arg7[%c8_152, %c0_153, %c0_154] : memref<9x4x4xbf16, #tpu.memory_space<vmem>>, vector<1x4x4xbf16>
    %161 = vector.shape_cast %160 : vector<1x4x4xbf16> to vector<4x4xbf16>
    %cst_155 = arith.constant dense<0.000000e+00> : vector<64x4xf32>
    %162 = tpu.matmul %159, %161, %cst_155 {dimension_numbers = #tpu.dot_dimension_numbers<[1], [0], [0], [1], [0, 0, 1, 1], [], []>} : vector<64x4xbf16>, vector<4x4xbf16>, vector<64x4xf32> -> vector<64x4xf32>
    %163 = arith.addf %156, %162 : vector<64x4xf32>
    %c0_156 = arith.constant 0 : index
    %c0_157 = arith.constant 0 : index
    %c0_158 = arith.constant 0 : index
    %c0_159 = arith.constant 0 : index
    %164 = vector.load %arg2[%c0_156, %c0_157, %c0_158, %c0_159] : memref<1x4x16x4xf32, #tpu.memory_space<vmem>>, vector<1x4x16x4xf32>
    %165 = vector.shape_cast %164 : vector<1x4x16x4xf32> to vector<4x16x4xf32>
    %166 = vector.shape_cast %163 : vector<64x4xf32> to vector<4x16x4xf32>
    %c0_160 = arith.constant 0 : index
    %c0_161 = arith.constant 0 : index
    %167 = vector.load %arg8[%c0_160, %c0_161] : memref<1x4xf32, #tpu.memory_space<vmem>>, vector<1x4xf32>
    %168 = vector.shape_cast %167 : vector<1x4xf32> to vector<1x1x4xf32>
    %169 = vector.broadcast %168 : vector<1x1x4xf32> to vector<4x16x4xf32>
    %170 = arith.addf %166, %169 : vector<4x16x4xf32>
    %171 = arith.addf %170, %165 : vector<4x16x4xf32>
    %cst_162 = arith.constant 0.000000e+00 : f32
    %172 = vector.broadcast %cst_162 : f32 to vector<4x16x4xf32>
    %173 = arith.maximumf %171, %172 : vector<4x16x4xf32>
    %c0_163 = arith.constant 0 : index
    %c0_164 = arith.constant 0 : index
    %c0_165 = arith.constant 0 : index
    %c0_166 = arith.constant 0 : index
    %174 = vector.load %arg9[%c0_163, %c0_164, %c0_165, %c0_166] : memref<1x4x16x4xf32, #tpu.memory_space<vmem>>, vector<1x4x16x4xf32>
    %175 = vector.shape_cast %174 : vector<1x4x16x4xf32> to vector<4x16x4xf32>
    %176 = vector.shape_cast %173 : vector<4x16x4xf32> to vector<1x4x16x4xf32>
    tpu.vector_store %arg9[%c0_163, %c0_164, %c0_165, %c0_166], %176 {strides = array<i32>} : memref<1x4x16x4xf32, #tpu.memory_space<vmem>>, vector<1x4x16x4xf32>,
    return
  }
  func.func @transform_0(%arg0: i32, %arg1: i32) -> (i32, i32, i32, i32) {
    %c0_i32 = arith.constant 0 : i32
    %c0_i32_0 = arith.constant 0 : i32
    %c0_i32_1 = arith.constant 0 : i32
    return %arg0, %arg1, %c0_i32, %c0_i32_0 : i32, i32, i32, i32
  }
  func.func @transform_1(%arg0: i32, %arg1: i32) -> (i32, i32, i32, i32) {
    %c2_i32 = arith.constant 2 : i32
    %0 = arith.muli %arg1, %c2_i32 : i32
    %c1_i32 = arith.constant 1 : i32
    %1 = arith.subi %0, %c1_i32 : i32
    %c0_i32 = arith.constant 0 : i32
    %2 = arith.maxsi %1, %c0_i32 : i32
    %c0_i32_0 = arith.constant 0 : i32
    %c0_i32_1 = arith.constant 0 : i32
    %c0_i32_2 = arith.constant 0 : i32
    return %arg0, %2, %c0_i32_0, %c0_i32_1 : i32, i32, i32, i32
  }
  func.func @transform_2(%arg0: i32, %arg1: i32) -> (i32, i32, i32, i32) {
    %c1_i32 = arith.constant 1 : i32
    %0 = arith.addi %arg1, %c1_i32 : i32
    %c2_i32 = arith.constant 2 : i32
    %1 = arith.muli %0, %c2_i32 : i32
    %c7_i32 = arith.constant 7 : i32
    %2 = arith.minsi %1, %c7_i32 : i32
    %c0_i32 = arith.constant 0 : i32
    %c0_i32_0 = arith.constant 0 : i32
    %c0_i32_1 = arith.constant 0 : i32
    return %arg0, %2, %c0_i32, %c0_i32_0 : i32, i32, i32, i32
  }
  func.func @transform_3(%arg0: i32, %arg1: i32) -> (i32, i32, i32) {
    %c0_i32 = arith.constant 0 : i32
    %c0_i32_0 = arith.constant 0 : i32
    %c0_i32_1 = arith.constant 0 : i32
    %c0_i32_2 = arith.constant 0 : i32
    return %c0_i32, %c0_i32_0, %c0_i32_1 : i32, i32, i32
  }
  func.func @transform_4(%arg0: i32, %arg1: i32) -> (i32, i32) {
    %c0_i32 = arith.constant 0 : i32
    %c0_i32_0 = arith.constant 0 : i32
    %c0_i32_1 = arith.constant 0 : i32
    return %c0_i32, %c0_i32_0 : i32, i32
  }
  func.func @transform_5(%arg0: i32, %arg1: i32) -> (i32, i32, i32) {
    %c0_i32 = arith.constant 0 : i32
    %c0_i32_0 = arith.constant 0 : i32
    %c0_i32_1 = arith.constant 0 : i32
    %c0_i32_2 = arith.constant 0 : i32
    return %c0_i32, %c0_i32_0, %c0_i32_1 : i32, i32, i32
  }
  func.func @transform_6(%arg0: i32, %arg1: i32) -> (i32, i32) {
    %c0_i32 = arith.constant 0 : i32
    %c0_i32_0 = arith.constant 0 : i32
    %c0_i32_1 = arith.constant 0 : i32
    return %c0_i32, %c0_i32_0 : i32, i32
  }
  func.func @transform_7(%arg0: i32, %arg1: i32) -> (i32, i32, i32, i32) {
    %c0_i32 = arith.constant 0 : i32
    %c0_i32_0 = arith.constant 0 : i32
    %c0_i32_1 = arith.constant 0 : i32
    return %arg0, %arg1, %c0_i32, %c0_i32_0 : i32, i32, i32, i32
  }
}

</mosaic_0001>

<bundles_post_ra>
// kernel: tpu_custom_call.1
= control target key start
LH: loop header
LB: loop body
LE: loop exit
PB: predicated region body
PF: predicated region fallthrough
CT: control target
= control target key end

     0   :  { %s3666_s24 = smov 0   ;;  %s3668_s25 = smov 0   ;;  %s4152_s0 = inlined_call_operand.vmem [shape: f32[2,16,16,4], index: 0, kind: input, shape index: {}]   ;;  %s4153_s1 = inlined_call_operand.vmem [shape: f32[2,16,16,4], index: 1, kind: input, shape index: {}]   ;;  %s4154_s2 = inlined_call_operand.vmem [shape: f32[2,16,16,4], index: 2, kind: input, shape index: {}]   ;;  %s4155_s3 = inlined_call_operand.vmem [shape: bf16[9,4,4], index: 3, kind: input, shape index: {}]   ;;  %s4156_s4 = inlined_call_operand.vmem [shape: f32[1,4], index: 4, kind: input, shape index: {}]   ;;  %s4157_s5 = inlined_call_operand.vmem [shape: bf16[9,4,4], index: 5, kind: input, shape index: {}]   ;;  %s4158_s6 = inlined_call_operand.vmem [shape: f32[1,4], index: 6, kind: input, shape index: {}]   ;;  %s4159_s7 = inlined_call_operand.vmem [shape: f32[2,16,16,4], index: 7, kind: output, shape index: {}]  }
   0x1   :  { %s3670_s26 = smov 0   ;;  %s3672_s27 = smov 0  }
   0x2   :  { %s3674_s28 = smov 0  }
   0x3 LB: > { %s26_s29 = sadd.s32 1, %s3611_s26  ;;  %s29_s30 = sadd.s32 1, %s3615_s27  ;;  %s3619_s28 = sphi %s3674_s28, %s17_s28   ;;  %s3615_s27 = sphi %s3672_s27, %s4163_s27   ;;  %s3611_s26 = sphi %s3670_s26, %s4162_s26   ;;  %s3607_s25 = sphi %s3668_s25, %s4161_s25   ;;  %s3603_s24 = sphi %s3666_s24, %s4160_s24  }
   0x4   : > { %p27_p0 = scmp.ge.s32.totalorder %s26_s29, 4  ;;  %p2889_p1 = scmp.ge.s32.totalorder %s3619_s28, 1 }
   0x5   : > { %p327_p2 = scmp.lt.s32.totalorder %s3619_s28, 9 }
   0x6   : > { %s4165_s29 = smov (%p27_p0, %s26_s29), 0  ;;  %s4167_s30 = smov (!%p27_p0, %s29_s30), %s3615_s27 }
   0x7   : > { %p328_p3 = pnand %p2889_p1, %p327_p2  ;;  %p31_p4 = scmp.ge.s32.totalorder %s4167_s30, 2 }
   0x8   : > { %vm458_vm0 = vcmask (!%p328_p3), 24576   ;;  %s2890_s8 = sshll.u32 (!%p328_p3), %s3603_s24, 2  ;;  %p398_p5 = scmp.lt.s32.totalorder (!%p328_p3), %s3607_s25, 1  ;;  %v3621_v0 = vmov (!%p328_p3), 0.0   ;;  %vm484_vm1 = vcmask (!%p328_p3), 31744  }
   0x9   : > { %s4169_s30 = smov (%p31_p4, %s4167_s30), 0  ;;  %331 = sbr.rel (%p328_p3) target bundleno = 826 (0x33a), region = 48 }
   0xa   : > { %459 = vst.msk [vmem:[#allocation2] sm:$0x1] (!%p328_p3), %vm458_vm0, %v3621_v0  ;;  %460 = vst.msk [vmem:[#allocation2 + $0x18] sm:$0x1] (!%p328_p3), %vm458_vm0, %v3621_v0  ;;  %p400_p6 = scmp.lt.s32.totalorder (!%p328_p3), %s2890_s8, 15  ;;  %s2894_s9 = sshll.u32 (!%p328_p3), %s3603_s24, 1 }
   0xb   : > { %461 = vst.msk [vmem:[#allocation2 + $0x30] sm:$0x1] (!%p328_p3), %vm458_vm0, %v3621_v0  ;;  %462 = vst.msk [vmem:[#allocation2 + $0x48] sm:$0x1] (!%p328_p3), %vm458_vm0, %v3621_v0  ;;  %s2895_s11 = sadd.s32 (!%p328_p3), 4294967295, %s2894_s9  ;;  %s3030_s14 = sadd.s32 (!%p328_p3), 2, %s2894_s9 }
   0xc   : > { %463 = vst.msk [vmem:[#allocation2 + $0x60] sm:$0x1] (!%p328_p3), %vm458_vm0, %v3621_v0  ;;  %464 = vst.msk [vmem:[#allocation2 + $0x78] sm:$0x1] (!%p328_p3), %vm458_vm0, %v3621_v0  ;;  %p410_p7 = scmp.gt.s32.totalorder (!%p328_p3), %s2895_s11, 0  ;;  %p429_p8 = scmp.lt.s32.totalorder (!%p328_p3), %s3030_s14, 7 }
   0xd   : > { %465 = vst.msk [vmem:[#allocation2 + $0x90] sm:$0x1] (!%p328_p3), %vm458_vm0, %v3621_v0  ;;  %466 = vst.msk [vmem:[#allocation2 + $0xa8] sm:$0x1] (!%p328_p3), %vm458_vm0, %v3621_v0  ;;  %p2909_p11 = scmp.ne.s32.totalorder (!%p328_p3), %s3603_s24, 0 }
   0xe   : > { %467 = vst.msk [vmem:[#allocation2 + $0x11] sm:$0x1] (!%p328_p3), %vm458_vm0, %v3621_v0  ;;  %468 = vst.msk [vmem:[#allocation2 + $0x29] sm:$0x1] (!%p328_p3), %vm458_vm0, %v3621_v0 }
   0xf   : > { %469 = vst.msk [vmem:[#allocation2 + $0x41] sm:$0x1] (!%p328_p3), %vm458_vm0, %v3621_v0  ;;  %470 = vst.msk [vmem:[#allocation2 + $0x59] sm:$0x1] (!%p328_p3), %vm458_vm0, %v3621_v0 }
  0x10   : > { %471 = vst.msk [vmem:[#allocation2 + $0x71] sm:$0x1] %vm458_vm0, %v3621_v0  ;;  %472 = vst.msk [vmem:[#allocation2 + $0x89] sm:$0x1] %vm458_vm0, %v3621_v0  ;;  %s4171_s25 = smov (!%p398_p5, %s3607_s25), 1  ;;  %s4173_s8 = smov (!%p400_p6, %s2890_s8), 15 }
  0x11   : > { %473 = vst.msk [vmem:[#allocation2 + $0xa1] sm:$0x1] %vm458_vm0, %v3621_v0  ;;  %474 = vst.msk [vmem:[#allocation2 + $0xb9] sm:$0x1] %vm458_vm0, %v3621_v0  ;;  %s3738_s10 = sshll.u32 %s4171_s25, 5  ;;  %s2891_s12 = sshll.u32 %s4173_s8, 1 }
  0x12   : > { %s404_s13 = sadd.s32 %s3738_s10, %s2891_s12  ;;  %s4175_s11 = smov (!%p410_p7, %s2895_s11), 0  ;;  %v3622_v9 = vmov (!%p2909_p11), 0.0  }
  0x13   : > { %s2893_s15 = sshll.u32 %s404_s13, 3  ;;  %s4177_s14 = smov (!%p429_p8, %s3030_s14), 7  ;;  %497 = vst.msk [vmem:[#allocation2 + $0x1] sm:$0xff] (!%p2909_p11), %vm484_vm1, %v3622_v9  ;;  %498 = vst.msk [vmem:[#allocation2 + $0x9] sm:$0xff] (!%p2909_p11), %vm484_vm1, %v3622_v9 }
  0x14   : > { %s3744_s18 = scalar_lea.vmem %s4152_s0, %s2893_s15  ;;  %s3749_s21 = scalar_lea.vmem %s4159_s7, %s2893_s15  ;;  %499 = vst.msk [vmem:[#allocation2 + $0x19] sm:$0xff] (!%p2909_p11), %vm484_vm1, %v3622_v9  ;;  %500 = vst.msk [vmem:[#allocation2 + $0x21] sm:$0xff] (!%p2909_p11), %vm484_vm1, %v3622_v9 }
  0x15   : > { %v475_v1 = vld [vmem:[%s3744_s18] sm:$0xff]  ;;  %v476_v2 = vld [vmem:[%s3744_s18 + $0x8] sm:$0xff]  ;;  %v477_v3 = vld [vmem:[%s3744_s18 + $0x10] sm:$0xff]  ;;  %s2896_s22 = sshll.u32 %s4175_s11, 1  ;;  %s2901_s23 = sshll.u32 %s4177_s14, 1 }
  0x16   : > { %485 = vst.msk [vmem:[#allocation2 + $0x31] sm:$0xff] %vm484_vm1, %v475_v1  ;;  %486 = vst.msk [vmem:[#allocation2 + $0x39] sm:$0xff] %vm484_vm1, %v476_v2  ;;  %v478_v4 = vld [vmem:[%s3744_s18 + $0x18] sm:$0xff]  ;;  %v479_v5 = vld [vmem:[%s3744_s18 + $0x20] sm:$0xff]  ;;  %p415_p9 = scmp.lt.s32.totalorder %s2896_s22, 15  ;;  %p434_p10 = scmp.lt.s32.totalorder %s2901_s23, 15 }
  0x17   : > { %487 = vst.msk [vmem:[#allocation2 + $0x49] sm:$0xff] %vm484_vm1, %v477_v3  ;;  %v480_v6 = vld [vmem:[%s3744_s18 + $0x28] sm:$0xff]  ;;  %488 = vst.msk [vmem:[#allocation2 + $0x51] sm:$0xff] %vm484_vm1, %v478_v4  ;;  %v481_v7 = vld [vmem:[%s3744_s18 + $0x30] sm:$0xff]  ;;  %496 = sbr.rel (%p2909_p11) target bundleno = 30 (0x1e), region = 52 }
  0x18   : > { %489 = vst.msk [vmem:[#allocation2 + $0x61] sm:$0xff] %vm484_vm1, %v479_v5  ;;  %490 = vst.msk [vmem:[#allocation2 + $0x69] sm:$0xff] %vm484_vm1, %v480_v6  ;;  %v482_v8 = vld [vmem:[%s3744_s18 + $0x38] sm:$0xff]  ;;  %s4179_s22 = smov (!%p415_p9, %s2896_s22), 15  ;;  %s4181_s23 = smov (!%p434_p10, %s2901_s23), 15 }
  0x19   : > { %491 = vst.msk [vmem:[#allocation2 + $0x79] sm:$0xff] %vm484_vm1, %v481_v7  ;;  %492 = vst.msk [vmem:[#allocation2 + $0x81] sm:$0xff] %vm484_vm1, %v482_v8  ;;  %s2897_s25 = sshll.u32 %s4179_s22, 1  ;;  %s2902_s9 = sshll.u32 %s4181_s23, 1 }
  0x1a   : > { %s419_s8 = sadd.s32 %s2897_s25, %s3738_s10  ;;  %s438_s12 = sadd.s32 %s2902_s9, %s3738_s10 }
  0x1b   : > { %s2899_s11 = sshll.u32 %s419_s8, 3  ;;  %s2904_s17 = sshll.u32 %s438_s12, 3 }
  0x1c   : > { %s421_s16 = scalar_lea.vmem %s4153_s1, %s2899_s11  ;;  %s3775_s14 = scalar_lea.vmem %s4154_s2, %s2904_s17 }
  0x1e PF: > { %p2910_p12 = scmp.le.s32.totalorder %s3603_s24, 0 }
  0x1f   : > { %v505_v10 = vld [vmem:[%s421_s16] sm:$0xff] (!%p2910_p12)  ;;  %v506_v11 = vld [vmem:[%s421_s16 + $0x8] sm:$0xff] (!%p2910_p12)  ;;  %v507_v12 = vld [vmem:[%s421_s16 + $0x10] sm:$0xff] (!%p2910_p12) }
  0x20   : > { %504 = sbr.rel (%p2910_p12) target bundleno = 39 (0x27), region = 56  ;;  %509 = vst.msk [vmem:[#allocation2 + $0x1] sm:$0xff] (!%p2910_p12), %vm484_vm1, %v505_v10  ;;  %510 = vst.msk [vmem:[#allocation2 + $0x9] sm:$0xff] (!%p2910_p12), %vm484_vm1, %v506_v11  ;;  %v508_v13 = vld [vmem:[%s421_s16 + $0x18] sm:$0xff] (!%p2910_p12) }
  0x21   : > { %511 = vst.msk [vmem:[#allocation2 + $0x19] sm:$0xff] (!%p2910_p12), %vm484_vm1, %v507_v12  ;;  %512 = vst.msk [vmem:[#allocation2 + $0x21] sm:$0xff] (!%p2910_p12), %vm484_vm1, %v508_v13 }
  0x27 PF: > { %p2911_p13 = scmp.ne.s32.totalorder %s3603_s24, 3 }
  0x28   : > { %v3623_v14 = vmov (!%p2911_p13), 0.0  }
  0x29   : > { %516 = sbr.rel (%p2911_p13) target bundleno = 48 (0x30), region = 60  ;;  %518 = vst.msk [vmem:[#allocation2 + $0x91] sm:$0xff] (!%p2911_p13), %vm484_vm1, %v3623_v14  ;;  %519 = vst.msk [vmem:[#allocation2 + $0x99] sm:$0xff] (!%p2911_p13), %vm484_vm1, %v3623_v14 }
  0x2a   : > { %520 = vst.msk [vmem:[#allocation2 + $0xa9] sm:$0xff] (!%p2911_p13), %vm484_vm1, %v3623_v14  ;;  %521 = vst.msk [vmem:[#allocation2 + $0xb1] sm:$0xff] (!%p2911_p13), %vm484_vm1, %v3623_v14 }
  0x30 PF: > { %p2912_p0 = scmp.ge.s32.totalorder %s3603_s24, 3 }
  0x31   : > { %v526_v15 = vld [vmem:[%s3775_s14] sm:$0xff] (!%p2912_p0)  ;;  %v527_v16 = vld [vmem:[%s3775_s14 + $0x8] sm:$0xff] (!%p2912_p0)  ;;  %v528_v17 = vld [vmem:[%s3775_s14 + $0x10] sm:$0xff] (!%p2912_p0) }
  0x32   : > { %525 = sbr.rel (%p2912_p0) target bundleno = 57 (0x39), region = 64  ;;  %531 = vst.msk [vmem:[#allocation2 + $0x91] sm:$0xff] (!%p2912_p0), %vm484_vm1, %v526_v15  ;;  %532 = vst.msk [vmem:[#allocation2 + $0x99] sm:$0xff] (!%p2912_p0), %vm484_vm1, %v527_v16  ;;  %v529_v18 = vld [vmem:[%s3775_s14 + $0x18] sm:$0xff] (!%p2912_p0) }
  0x33   : > { %533 = vst.msk [vmem:[#allocation2 + $0xa9] sm:$0xff] (!%p2912_p0), %vm484_vm1, %v528_v17  ;;  %534 = vst.msk [vmem:[#allocation2 + $0xb1] sm:$0xff] (!%p2912_p0), %vm484_vm1, %v529_v18 }
  0x39 PF: > { %v3808_v19 = vld [vmem:[%s4155_s3] sm:$0x3]  ;;  %vm592_vm2 = vcmask 1041408   ;;  %v536_v21 = vld [vmem:[#allocation2 + $0x8] sm:$0xff]  ;;  %1749 = vst.msk [vmem:[#allocation3] sm:$0x1] %vm458_vm0, %v3621_v0 }
  0x3a   : > { %v535_v20 = vld [vmem:[#allocation2] sm:$0xff]  ;;  %1750 = vst.msk [vmem:[#allocation3 + $0x18] sm:$0x1] %vm458_vm0, %v3621_v0  ;;  %1751 = vst.msk [vmem:[#allocation3 + $0x30] sm:$0x1] %vm458_vm0, %v3621_v0  ;;  %3518 = vmatprep.subr.msk.bf16.mxu0 %vm592_vm2, %v3808_v19  ;;  %v696_v22 = vsel %vm592_vm2, %v3808_v19, 0 }
  0x3b   : > { %1752 = vst.msk [vmem:[#allocation3 + $0x48] sm:$0x1] %vm458_vm0, %v3621_v0  ;;  %1753 = vst.msk [vmem:[#allocation3 + $0x60] sm:$0x1] %vm458_vm0, %v3621_v0  ;;  %v547_v23 = vpack.c.bf16 %v536_v21, %v535_v20  ;;  %v537_v24 = vld [vmem:[#allocation2 + $0x18] sm:$0xff]  ;;  %v538_v25 = vld [vmem:[#allocation2 + $0x20] sm:$0xff]  ;;  %3154 = vmatpush3.bf16.msra.mxu0 %v696_v22 }
  0x3c   : > { %1754 = vst.msk [vmem:[#allocation3 + $0x78] sm:$0x1] %vm458_vm0, %v3621_v0  ;;  %1755 = vst.msk [vmem:[#allocation3 + $0x11] sm:$0x1] %vm458_vm0, %v3621_v0  ;;  %v2926_v26 = vld [vmem:[%s4155_s3 + $0x4] sm:$0x3]  ;;  %v3841_v27 = vpack.c.bf16 %v538_v25, %v537_v24 }
  0x3d   : > { %1756 = vst.msk [vmem:[#allocation3 + $0x29] sm:$0x1] %vm458_vm0, %v3621_v0  ;;  %1757 = vst.msk [vmem:[#allocation3 + $0x41] sm:$0x1] %vm458_vm0, %v3621_v0  ;;  %v779_v28 = vld [vmem:[#allocation2 + $0x2] sm:$0xff]  ;;  %v780_v29 = vld [vmem:[#allocation2 + $0xa] sm:$0xff]  ;;  %3155 = vmatprep.mubr.msk.bf16.mxu0 %vm484_vm1, %v547_v23  ;;  %3520 = vmatprep.subr.msk.bf16.mxu0 %vm592_vm2, %v2926_v26 }
  0x3e   : > { %1758 = vst.msk [vmem:[#allocation3 + $0x59] sm:$0x1] %vm458_vm0, %v3621_v0  ;;  %1759 = vst.msk [vmem:[#allocation3 + $0x71] sm:$0x1] %vm458_vm0, %v3621_v0  ;;  %v818_v30 = vsel %vm592_vm2, %v2926_v26, 0  ;;  %v791_v31 = vpack.c.bf16 %v780_v29, %v779_v28  ;;  %3156 = vmatmul.mubr.msk.bf16.vlgmr.msra.gmra.mrb[0].mxu0 %vm484_vm1, %v3841_v27  ;;  %v781_v33 = vld [vmem:[#allocation2 + $0x1a] sm:$0xff] }
  0x3f   : > { %1760 = vst.msk [vmem:[#allocation3 + $0x89] sm:$0x1] %vm458_vm0, %v3621_v0  ;;  %v2933_v32 = vld [vmem:[%s4155_s3 + $0x6] sm:$0x3]  ;;  %3168 = vmatpush3.bf16.msra.mxu0 %v818_v30  ;;  %v783_v35 = vld [vmem:[#allocation2 + $0x32] sm:$0xff]  ;;  %v784_v36 = vld [vmem:[#allocation2 + $0x3a] sm:$0xff] }
  0x40   : > { %3169 = vmatprep.mubr.msk.bf16.mxu0 %vm484_vm1, %v791_v31  ;;  %3521 = vmatprep.subr.msk.bf16.mxu0 %vm592_vm2, %v2933_v32  ;;  %v782_v34 = vld [vmem:[#allocation2 + $0x22] sm:$0xff]  ;;  %v3855_v38 = vpack.c.bf16 %v784_v36, %v783_v35  ;;  %v1048_v40 = vld [vmem:[#allocation2 + $0x19] sm:$0xff]  ;;  %v953_v41 = vsel %vm592_vm2, %v2933_v32, 0  ;;  %v1050_v43 = vld [vmem:[#allocation2 + $0x31] sm:$0xff]  ;;  %vm1778_vm3 = vcmask (!%p2909_p11), 25600  }
  0x41   : > { %v3853_v37 = vpack.c.bf16 %v782_v34, %v781_v33  ;;  %v2940_v39 = vld [vmem:[%s4155_s3 + $0x8] sm:$0x3]  ;;  %v2913_v44 = vld [vmem:[%s4155_s3 + $0x2] sm:$0x3]  ;;  %v1051_v45 = vld [vmem:[#allocation2 + $0x39] sm:$0xff] }
  0x42   : > { %v1049_v42 = vld [vmem:[#allocation2 + $0x21] sm:$0xff]  ;;  %3517 = vmatprep.subr.msk.bf16.mxu1 %vm592_vm2, %v2913_v44  ;;  %v594_v46 = vsel %vm592_vm2, %v2913_v44, 0  ;;  %v555_v48 = vld [vmem:[#allocation2 + $0x9] sm:$0xff]  ;;  %v786_v51 = vld [vmem:[#allocation2 + $0x52] sm:$0xff]  ;;  %v3871_v55 = vpack.c.bf16 %v1051_v45, %v1050_v43  ;;  %v1087_v12 = vsel %vm592_vm2, %v2940_v39, 0 }
  0x43   : > { %v554_v47 = vld [vmem:[#allocation2 + $0x1] sm:$0xff]  ;;  %3140 = vmatpush3.bf16.msra.mxu1 %v594_v46  ;;  %v785_v50 = vld [vmem:[#allocation2 + $0x4a] sm:$0xff]  ;;  %v1060_v52 = vpack.c.bf16 %v1049_v42, %v1048_v40  ;;  %v1056_v3 = vld [vmem:[#allocation2 + $0x79] sm:$0xff] }
  0x44   : > { %v566_v49 = vpack.c.bf16 %v555_v48, %v554_v47  ;;  %v787_v53 = vld [vmem:[#allocation2 + $0x62] sm:$0xff]  ;;  %v788_v54 = vld [vmem:[#allocation2 + $0x6a] sm:$0xff]  ;;  %3519 = vmatprep.subr.msk.bf16.mxu1 %vm592_vm2, %v3808_v19  ;;  %v3877_v56 = vpack.c.bf16 %v786_v51, %v785_v50  ;;  %v789_v62 = vld [vmem:[#allocation2 + $0x7a] sm:$0xff] }
  0x45   : > { %v3881_v57 = vpack.c.bf16 %v788_v54, %v787_v53  ;;  %v1052_v58 = vld [vmem:[#allocation2 + $0x49] sm:$0xff]  ;;  %v1053_v59 = vld [vmem:[#allocation2 + $0x51] sm:$0xff]  ;;  %v1054_v60 = vld [vmem:[#allocation2 + $0x61] sm:$0xff] }
  0x46   : > { %3141 = vmatprep.mubr.msk.bf16.mxu1 %vm484_vm1, %v566_v49  ;;  %v1055_v61 = vld [vmem:[#allocation2 + $0x69] sm:$0xff]  ;;  %v3887_v0 = vpack.c.bf16 %v1053_v59, %v1052_v58  ;;  %v1057_v4 = vld [vmem:[#allocation2 + $0x81] sm:$0xff]  ;;  %v917_v6 = vld [vmem:[#allocation2 + $0x38] sm:$0xff] }
  0x47   : > { %3142 = vmatmul.mubr.msk.bf16.vlgmr.msra.gmra.mrb[0].mxu1 %vm484_vm1, %v1060_v52  ;;  %v790_v63 = vld [vmem:[#allocation2 + $0x82] sm:$0xff]  ;;  %v3889_v1 = vpack.c.bf16 %v1055_v61, %v1054_v60  ;;  %v916_v5 = vld [vmem:[#allocation2 + $0x30] sm:$0xff]  ;;  %v3901_v7 = vpack.c.bf16 %v1057_v4, %v1056_v3  ;;  %v2947_v15 = vld [vmem:[%s4155_s3 + $0xa] sm:$0x3] }
  0x48   : > { %3145 = vmatprep.mubr.msk.bf16.mxu1 %vm484_vm1, %v3871_v55  ;;  %3356 = vmatpush3.bf16.msra.mxu1 %v696_v22  ;;  %v3893_v2 = vpack.c.bf16 %v790_v63, %v789_v62  ;;  %v927_v8 = vpack.c.bf16 %v917_v6, %v916_v5  ;;  %v918_v9 = vld [vmem:[#allocation2 + $0x48] sm:$0xff]  ;;  %v919_v10 = vld [vmem:[#allocation2 + $0x50] sm:$0xff]  ;;  %v920_v13 = vld [vmem:[#allocation2 + $0x60] sm:$0xff]  ;;  %v1221_v23 = vsel %vm592_vm2, %v2947_v15, 0 }
  0x49   : > { %v928_v11 = vpack.c.bf16 %v919_v10, %v918_v9  ;;  %v921_v14 = vld [vmem:[#allocation2 + $0x68] sm:$0xff]  ;;  %v922_v17 = vld [vmem:[#allocation2 + $0x78] sm:$0xff]  ;;  %v923_v18 = vld [vmem:[#allocation2 + $0x80] sm:$0xff] }
  0x4a   : > { %3170 = vmatmul.mubr.msk.bf16.vlgmr.msra.gmra.mrb[0].mxu0 %vm484_vm1, %v3853_v37  ;;  %v929_v16 = vpack.c.bf16 %v921_v14, %v920_v13  ;;  %v930_v19 = vpack.c.bf16 %v923_v18, %v922_v17  ;;  %v924_v20 = vld [vmem:[#allocation2 + $0x90] sm:$0xff]  ;;  %v925_v21 = vld [vmem:[#allocation2 + $0x98] sm:$0xff]  ;;  %v2954_v24 = vld [vmem:[%s4155_s3 + $0xc] sm:$0x3] }
  0x4b   : > { %3182 = vmatpush3.bf16.msra.mxu0 %v953_v41  ;;  %3173 = vmatprep.mubr.msk.bf16.mxu0 %vm484_vm1, %v3855_v38  ;;  %v931_v22 = vpack.c.bf16 %v925_v21, %v924_v20  ;;  %v1058_v25 = vld [vmem:[#allocation2 + $0x91] sm:$0xff]  ;;  %v1059_v26 = vld [vmem:[#allocation2 + $0x99] sm:$0xff]  ;;  %v1355_v28 = vsel %vm592_vm2, %v2954_v24, 0  ;;  %v2961_v29 = vld [vmem:[%s4155_s3 + $0xe] sm:$0x3] }
  0x4c   : > { %3522 = vmatprep.subr.msk.bf16.mxu0 %vm592_vm2, %v2940_v39  ;;  %v1192_v30 = vld [vmem:[#allocation2 + $0x92] sm:$0xff]  ;;  %v1193_v31 = vld [vmem:[#allocation2 + $0x9a] sm:$0xff]  ;;  %v1489_v33 = vsel %vm592_vm2, %v2961_v29, 0  ;;  %v2968_v34 = vld [vmem:[%s4155_s3 + $0x10] sm:$0x3] }
  0x4d   : > { %v1199_v32 = vpack.c.bf16 %v1193_v31, %v1192_v30  ;;  %v1326_v35 = vld [vmem:[#allocation2 + $0xa8] sm:$0xff]  ;;  %v1327_v36 = vld [vmem:[#allocation2 + $0xb0] sm:$0xff]  ;;  %v1623_v39 = vsel %vm592_vm2, %v2968_v34, 0  ;;  %v2975_v58 = vld [vmem:[%s4156_s4] ss:$0 sm:$0xff] }
  0x4e   : > { %v1460_v40 = vld [vmem:[#allocation2 + $0xa9] sm:$0xff]  ;;  %v1461_v41 = vld [vmem:[#allocation2 + $0xb1] sm:$0xff] }
  0x4f   : > { %3146 = vmatmul.mubr.msk.bf16.gmra.mrb[4].mxu1 %vm484_vm1, %v3887_v0  ;;  %v1467_v42 = vpack.c.bf16 %v1461_v41, %v1460_v40  ;;  %v1594_v43 = vld [vmem:[#allocation2 + $0xaa] sm:$0xff]  ;;  %v1595_v44 = vld [vmem:[#allocation2 + $0xb2] sm:$0xff] }
  0x50   : > { %3149 = vmatprep.mubr.msk.bf16.mxu1 %vm484_vm1, %v3889_v1  ;;  %v1601_v45 = vpack.c.bf16 %v1595_v44, %v1594_v43  ;;  %v3624_v43 = vmov (!%p2909_p11), 0.0  }
  0x52   : > { %3174 = vmatmul.mubr.msk.bf16.gmra.mrb[4].mxu0 %vm484_vm1, %v3877_v56 }
  0x53   : > { %3177 = vmatprep.mubr.msk.bf16.mxu0 %vm484_vm1, %v3881_v57 }
  0x57   : > { %3150 = vmatmul.mubr.msk.bf16.gmra.mrb[8].mxu1 %vm484_vm1, %v3901_v7 }
  0x58   : > { %3159 = vmatprep.mubr.msk.bf16.mxu1 %vm484_vm1, %v927_v8 }
  0x5a   : > { %3178 = vmatmul.mubr.msk.bf16.gmra.mrb[8].mxu0 %vm484_vm1, %v3893_v2 }
  0x5b   : > { %3183 = vmatprep.mubr.msk.bf16.mxu0 %vm484_vm1, %v3841_v27  ;;  %v1065_v27 = vpack.c.bf16 %v1059_v26, %v1058_v25 }
  0x5f   : > { %3160 = vmatmul.mubr.msk.bf16.vlgmr.msra.gmra.mrb[4].mxu1 %vm484_vm1, %v928_v11 }
  0x60   : > { %3163 = vmatprep.mubr.msk.bf16.mxu1 %vm484_vm1, %v929_v16 }
  0x62   : > { %3184 = vmatmul.mubr.msk.bf16.vlgmr.msra.gmra.mrb[0].mxu0 %vm484_vm1, %v927_v8 }
  0x63   : > { %3196 = vmatpush3.bf16.msra.mxu0 %v1087_v12  ;;  %3187 = vmatprep.mubr.msk.bf16.mxu0 %vm484_vm1, %v928_v11 }
  0x64   : > { %3523 = vmatprep.subr.msk.bf16.mxu0 %vm592_vm2, %v2947_v15 }
  0x67   : > { %3164 = vmatmul.mubr.msk.bf16.gmra.mrb[8].mxu1 %vm484_vm1, %v930_v19 }
  0x6a   : > { %3188 = vmatmul.mubr.msk.bf16.gmra.mrb[4].mxu0 %vm484_vm1, %v929_v16 }
  0x6b   : > { %3191 = vmatprep.mubr.msk.bf16.mxu0 %vm484_vm1, %v930_v19 }
  0x72   : > { %3192 = vmatmul.mubr.msk.bf16.gmra.mrb[8].mxu0 %vm484_vm1, %v931_v22 }
  0x73   : > { %3197 = vmatprep.mubr.msk.bf16.mxu0 %vm484_vm1, %v1060_v52 }
  0x7a   : > { %3198 = vmatmul.mubr.msk.bf16.vlgmr.msra.gmra.mrb[0].mxu0 %vm484_vm1, %v3871_v55 }
  0x7b   : > { %3210 = vmatpush3.bf16.msra.mxu0 %v1221_v23  ;;  %3201 = vmatprep.mubr.msk.bf16.mxu0 %vm484_vm1, %v3887_v0 }
  0x7c   : > { %3524 = vmatprep.subr.msk.bf16.mxu0 %vm592_vm2, %v2954_v24 }
  0x82   : > { %3202 = vmatmul.mubr.msk.bf16.gmra.mrb[4].mxu0 %vm484_vm1, %v3889_v1 }
  0x83   : > { %3205 = vmatprep.mubr.msk.bf16.mxu0 %vm484_vm1, %v3901_v7 }
  0x8a   : > { %3206 = vmatmul.mubr.msk.bf16.gmra.mrb[8].mxu0 %vm484_vm1, %v1065_v27 }
  0x8b   : > { %3211 = vmatprep.mubr.msk.bf16.mxu0 %vm484_vm1, %v3853_v37  ;;  %v1333_v37 = vpack.c.bf16 %v1327_v36, %v1326_v35 }
  0x92   : > { %3212 = vmatmul.mubr.msk.bf16.vlgmr.msra.gmra.mrb[0].mxu0 %vm484_vm1, %v3855_v38 }
  0x93   : > { %3224 = vmatpush3.bf16.msra.mxu0 %v1355_v28  ;;  %3215 = vmatprep.mubr.msk.bf16.mxu0 %vm484_vm1, %v3877_v56 }
  0x94   : > { %3525 = vmatprep.subr.msk.bf16.mxu0 %vm592_vm2, %v2961_v29 }
  0x9a   : > { %3216 = vmatmul.mubr.msk.bf16.gmra.mrb[4].mxu0 %vm484_vm1, %v3881_v57 }
  0x9b   : > { %3219 = vmatprep.mubr.msk.bf16.mxu0 %vm484_vm1, %v3893_v2 }
  0xa2   : > { %3220 = vmatmul.mubr.msk.bf16.gmra.mrb[8].mxu0 %vm484_vm1, %v1199_v32 }
  0xa3   : > { %3225 = vmatprep.mubr.msk.bf16.mxu0 %vm484_vm1, %v927_v8 }
  0xaa   : > { %3226 = vmatmul.mubr.msk.bf16.vlgmr.msra.gmra.mrb[0].mxu0 %vm484_vm1, %v928_v11 }
  0xab   : > { %3238 = vmatpush3.bf16.msra.mxu0 %v1489_v33  ;;  %3229 = vmatprep.mubr.msk.bf16.mxu0 %vm484_vm1, %v929_v16 }
  0xac   : > { %3526 = vmatprep.subr.msk.bf16.mxu0 %vm592_vm2, %v2968_v34 }
  0xb2   : > { %3230 = vmatmul.mubr.msk.bf16.gmra.mrb[4].mxu0 %vm484_vm1, %v930_v19 }
  0xb3   : > { %3233 = vmatprep.mubr.msk.bf16.mxu0 %vm484_vm1, %v931_v22 }
  0xba   : > { %3234 = vmatmul.mubr.msk.bf16.gmra.mrb[8].mxu0 %vm484_vm1, %v1333_v37 }
  0xbb   : > { %3239 = vmatprep.mubr.msk.bf16.mxu0 %vm484_vm1, %v3871_v55 }
  0xc2   : > { %3240 = vmatmul.mubr.msk.bf16.vlgmr.msra.gmra.mrb[0].mxu0 %vm484_vm1, %v3887_v0 }
  0xc3   : > { %3252 = vmatpush3.bf16.msra.mxu0 %v1623_v39  ;;  %3243 = vmatprep.mubr.msk.bf16.mxu0 %vm484_vm1, %v3889_v1 }
  0xca   : > { %3244 = vmatmul.mubr.msk.bf16.gmra.mrb[4].mxu0 %vm484_vm1, %v3901_v7 }
  0xcb   : > { %3247 = vmatprep.mubr.msk.bf16.mxu0 %vm484_vm1, %v1065_v27 }
  0xd2   : > { %3248 = vmatmul.mubr.msk.bf16.gmra.mrb[8].mxu0 %vm484_vm1, %v1467_v42 }
  0xd3   : > { %3253 = vmatprep.mubr.msk.bf16.mxu0 %vm484_vm1, %v3855_v38 }
  0xda   : > { %3254 = vmatmul.mubr.msk.bf16.vlgmr.msra.gmra.mrb[0].mxu0 %vm484_vm1, %v3877_v56 }
  0xdb   : > { %3257 = vmatprep.mubr.msk.bf16.mxu0 %vm484_vm1, %v3881_v57 }
  0xe2   : > { %3258 = vmatmul.mubr.msk.bf16.gmra.mrb[4].mxu0 %vm484_vm1, %v3893_v2 }
  0xe3   : > { %3261 = vmatprep.mubr.msk.bf16.mxu0 %vm484_vm1, %v1199_v32 }
  0xea   : > { %3262 = vmatmul.mubr.msk.bf16.gmra.mrb[8].mxu0 %vm484_vm1, %v1601_v45 }
 0x11a   : > { %v3143_v46 = vpop.f32.mrb[0].mxu1 }
 0x11b   : > { %v630_v47 = vpop.f32.mrb[1].mxu1 }
 0x11c   : > { %v3144_v48 = vpop.f32.mrb[2].mxu1 }
 0x11d   : > { %v633_v38 = vpop.f32.mrb[3].mxu1 }
 0x132   : > { %v3161_v49 = vpop.f32.mrb[4].mxu1 }
 0x133   : > { %v748_v50 = vpop.f32.mrb[5].mxu1 }
 0x134   : > { %v3162_v51 = vpop.f32.mrb[6].mxu1 }
 0x135   : > { %v751_v52 = vpop.f32.mrb[7].mxu1 }
 0x13a   : > { %v3165_v53 = vpop.f32.mrb[8].mxu1 }
 0x13b   : > { %v764_v54 = vpop.f32.mrb[9].mxu1 }
 0x13c   : > { %v3166_v55 = vpop.f32.mrb[10].mxu1 }
 0x13d   : > { %v767_v56 = vpop.f32.mrb[11].mxu1 }
 0x1ad   : > { %v3255_v57 = vpop.f32.mrb[0].mxu0 }
 0x1ae   : > { %v3357_v59 = vadd.f32 %v3255_v57, %v3143_v46  ;;  %v1659_v60 = vpop.f32.mrb[1].mxu0 }
 0x1af   : > { %v3358_v61 = vadd.f32 %v1659_v60, %v630_v47  ;;  %v3256_v62 = vpop.f32.mrb[2].mxu0 }
 0x1b0   : > { %v1727_v63 = vadd.f32 %v3357_v59, %v2975_v58  ;;  %v3359_v0 = vadd.f32 %v3256_v62, %v3144_v48  ;;  %v1662_v1 = vpop.f32.mrb[3].mxu0 }
 0x1b1   : > { %v1725_v2 = vadd.f32 %v3358_v61, %v2975_v58  ;;  %v3360_v3 = vadd.f32 %v1662_v1, %v633_v38 }
 0x1b2   : > { %v1739_v4 = vmax.f32 %v1727_v63, 0.0  ;;  %v1728_v5 = vadd.f32 %v3359_v0, %v2975_v58 }
 0x1b3   : > { %v1737_v6 = vmax.f32 %v1725_v2, 0.0  ;;  %v1726_v7 = vadd.f32 %v3360_v3, %v2975_v58 }
 0x1b4   : > { %1763 = vst.msk [vmem:[#allocation3 + $0x19] sm:$0xff] %vm484_vm1, %v1739_v4  ;;  %v1740_v8 = vmax.f32 %v1728_v5, 0.0 }
 0x1b5   : > { %1761 = vst.msk [vmem:[#allocation3 + $0x1] sm:$0xff] %vm484_vm1, %v1737_v6  ;;  %v1738_v9 = vmax.f32 %v1726_v7, 0.0  ;;  %v3259_v10 = vpop.f32.mrb[4].mxu0 }
 0x1b6   : > { %1764 = vst.msk [vmem:[#allocation3 + $0x21] sm:$0xff] %vm484_vm1, %v1740_v8  ;;  %v3361_v11 = vadd.f32 %v3259_v10, %v3161_v49  ;;  %v1675_v12 = vpop.f32.mrb[5].mxu0  ;;  %1776 = vst.msk [vmem:[#allocation3] sm:$0xff] (!%p2909_p11), %vm484_vm1, %v3624_v43 }
 0x1b7   : > { %1762 = vst.msk [vmem:[#allocation3 + $0x9] sm:$0xff] %vm484_vm1, %v1738_v9  ;;  %v3362_v13 = vadd.f32 %v1675_v12, %v748_v50  ;;  %v3260_v14 = vpop.f32.mrb[6].mxu0 }
 0x1b8   : > { %v1731_v15 = vadd.f32 %v3361_v11, %v2975_v58  ;;  %v3363_v16 = vadd.f32 %v3260_v14, %v3162_v51  ;;  %v1678_v17 = vpop.f32.mrb[7].mxu0  ;;  %1777 = vst.msk [vmem:[#allocation3 + $0x8] sm:$0xff] (!%p2909_p11), %vm484_vm1, %v3624_v43 }
 0x1b9   : > { %v1729_v18 = vadd.f32 %v3362_v13, %v2975_v58  ;;  %v3364_v19 = vadd.f32 %v1678_v17, %v751_v52  ;;  %1779 = vst.msk [vmem:[#allocation3 + $0x10] sm:$0x3] (!%p2909_p11), %vm1778_vm3, %v3624_v43 }
 0x1ba   : > { %v1743_v20 = vmax.f32 %v1731_v15, 0.0  ;;  %v1732_v21 = vadd.f32 %v3363_v16, %v2975_v58 }
 0x1bb   : > { %v1741_v22 = vmax.f32 %v1729_v18, 0.0  ;;  %v1730_v23 = vadd.f32 %v3364_v19, %v2975_v58 }
 0x1bc   : > { %1767 = vst.msk [vmem:[#allocation3 + $0x49] sm:$0xff] %vm484_vm1, %v1743_v20  ;;  %v1744_v24 = vmax.f32 %v1732_v21, 0.0 }
 0x1bd   : > { %1765 = vst.msk [vmem:[#allocation3 + $0x31] sm:$0xff] %vm484_vm1, %v1741_v22  ;;  %v1742_v25 = vmax.f32 %v1730_v23, 0.0  ;;  %v3263_v26 = vpop.f32.mrb[8].mxu0 }
 0x1be   : > { %1768 = vst.msk [vmem:[#allocation3 + $0x51] sm:$0xff] %vm484_vm1, %v1744_v24  ;;  %v3365_v27 = vadd.f32 %v3263_v26, %v3165_v53  ;;  %v1691_v28 = vpop.f32.mrb[9].mxu0 }
 0x1bf   : > { %1766 = vst.msk [vmem:[#allocation3 + $0x39] sm:$0xff] %vm484_vm1, %v1742_v25  ;;  %v3366_v29 = vadd.f32 %v1691_v28, %v764_v54  ;;  %v3264_v30 = vpop.f32.mrb[10].mxu0 }
 0x1c0   : > { %v1735_v31 = vadd.f32 %v3365_v27, %v2975_v58  ;;  %v3367_v32 = vadd.f32 %v3264_v30, %v3166_v55  ;;  %v1694_v33 = vpop.f32.mrb[11].mxu0 }
 0x1c1   : > { %v1733_v34 = vadd.f32 %v3366_v29, %v2975_v58  ;;  %v3368_v35 = vadd.f32 %v1694_v33, %v767_v56  ;;  %1775 = sbr.rel (%p2909_p11) target bundleno = 456 (0x1c8), region = 68 }
 0x1c2   : > { %v1747_v36 = vmax.f32 %v1735_v31, 0.0  ;;  %v1736_v37 = vadd.f32 %v3367_v32, %v2975_v58 }
 0x1c3   : > { %v1745_v39 = vmax.f32 %v1733_v34, 0.0  ;;  %v1734_v40 = vadd.f32 %v3368_v35, %v2975_v58 }
 0x1c4   : > { %1771 = vst.msk [vmem:[#allocation3 + $0x79] sm:$0xff] %vm484_vm1, %v1747_v36  ;;  %v1748_v41 = vmax.f32 %v1736_v37, 0.0 }
 0x1c5   : > { %1769 = vst.msk [vmem:[#allocation3 + $0x61] sm:$0xff] %vm484_vm1, %v1745_v39  ;;  %v1746_v42 = vmax.f32 %v1734_v40, 0.0 }
 0x1c6   : > { %1772 = vst.msk [vmem:[#allocation3 + $0x81] sm:$0xff] %vm484_vm1, %v1748_v41 }
 0x1c7   : > { %1770 = vst.msk [vmem:[#allocation3 + $0x69] sm:$0xff] %vm484_vm1, %v1746_v42 }
 0x1c8 PF: > { %1782 = sbr.rel (%p2911_p13) target bundleno = 463 (0x1cf), region = 72  ;;  %vm1786_vm4 = vcmask (!%p2911_p13), 25600   ;;  %v3625_v44 = vmov (!%p2911_p13), 0.0  }
 0x1c9   : > { %1784 = vst.msk [vmem:[#allocation3 + $0x78] sm:$0xff] (!%p2911_p13), %vm484_vm1, %v3625_v44  ;;  %1785 = vst.msk [vmem:[#allocation3 + $0x80] sm:$0xff] (!%p2911_p13), %vm484_vm1, %v3625_v44 }
 0x1ca   : > { %1787 = vst.msk [vmem:[#allocation3 + $0x88] sm:$0x3] (!%p2911_p13), %vm1786_vm4, %v3625_v44 }
 0x1cf PF: > { %v2978_v45 = vld [vmem:[%s4157_s5 + $0x2] sm:$0x3]  ;;  %v1802_v47 = vld [vmem:[#allocation3 + $0x9] sm:$0xff]  ;;  %v1803_v49 = vld [vmem:[#allocation3 + $0x19] sm:$0xff] }
 0x1d0   : > { %v1801_v46 = vld [vmem:[#allocation3 + $0x1] sm:$0xff]  ;;  %3527 = vmatprep.subr.msk.bf16.mxu1 %vm592_vm2, %v2978_v45  ;;  %v1828_v48 = vsel %vm592_vm2, %v2978_v45, 0  ;;  %v1805_v53 = vld [vmem:[#allocation3 + $0x31] sm:$0xff]  ;;  %v1806_v54 = vld [vmem:[#allocation3 + $0x39] sm:$0xff] }
 0x1d1   : > { %v1809_v38 = vpack.c.bf16 %v1802_v47, %v1801_v46  ;;  %v1804_v50 = vld [vmem:[#allocation3 + $0x21] sm:$0xff]  ;;  %3266 = vmatpush3.bf16.msra.mxu1 %v1828_v48  ;;  %v4018_v56 = vpack.c.bf16 %v1806_v54, %v1805_v53  ;;  %v1807_v58 = vld [vmem:[#allocation3 + $0x49] sm:$0xff]  ;;  %v1808_v59 = vld [vmem:[#allocation3 + $0x51] sm:$0xff] }
 0x1d2   : > { %v1800_v51 = vld [vmem:[%s4157_s5] sm:$0x3]  ;;  %v4013_v52 = vpack.c.bf16 %v1804_v50, %v1803_v49  ;;  %v2987_v57 = vld [vmem:[%s4157_s5 + $0x4] sm:$0x3]  ;;  %v1789_v61 = vld [vmem:[#allocation3 + $0x8] sm:$0xff]  ;;  %v4028_v62 = vpack.c.bf16 %v1808_v59, %v1807_v58 }
 0x1d3   : > { %3267 = vmatprep.mubr.msk.bf16.mxu1 %vm484_vm1, %v1809_v38  ;;  %v1908_v55 = vsel %vm592_vm2, %v1800_v51, 0  ;;  %3528 = vmatprep.subr.msk.bf16.mxu1 %vm592_vm2, %v1800_v51  ;;  %v1788_v60 = vld [vmem:[#allocation3] sm:$0xff]  ;;  %v1790_v0 = vld [vmem:[#allocation3 + $0x18] sm:$0xff]  ;;  %v1792_v2 = vld [vmem:[#allocation3 + $0x30] sm:$0xff]  ;;  %v2002_v6 = vsel %vm592_vm2, %v2987_v57, 0 }
 0x1d4   : > { %3268 = vmatmul.mubr.msk.bf16.vlgmr.msra.gmra.mrb[12].mxu1 %vm484_vm1, %v4013_v52  ;;  %v1796_v63 = vpack.c.bf16 %v1789_v61, %v1788_v60  ;;  %v1791_v1 = vld [vmem:[#allocation3 + $0x20] sm:$0xff]  ;;  %v1793_v3 = vld [vmem:[#allocation3 + $0x38] sm:$0xff]  ;;  %v1794_v8 = vld [vmem:[#allocation3 + $0x48] sm:$0xff] }
 0x1d5   : > { %3276 = vmatpush3.bf16.msra.mxu1 %v1908_v55  ;;  %3271 = vmatprep.mubr.msk.bf16.mxu1 %vm484_vm1, %v4018_v56  ;;  %v1797_v4 = vpack.c.bf16 %v1791_v1, %v1790_v0  ;;  %v4033_v5 = vpack.c.bf16 %v1793_v3, %v1792_v2  ;;  %v2992_v7 = vld [vmem:[%s4157_s5 + $0x6] sm:$0x3]  ;;  %v1795_v9 = vld [vmem:[#allocation3 + $0x50] sm:$0xff]  ;;  %v1977_v14 = vld [vmem:[#allocation3 + $0x1a] sm:$0xff] }
 0x1d6   : > { %3529 = vmatprep.subr.msk.bf16.mxu1 %vm592_vm2, %v2987_v57  ;;  %v1975_v10 = vld [vmem:[#allocation3 + $0x2] sm:$0xff]  ;;  %v1976_v11 = vld [vmem:[#allocation3 + $0xa] sm:$0xff]  ;;  %v1799_v12 = vpack.c.bf16 %v1795_v9, %v1794_v8  ;;  %v1979_v16 = vld [vmem:[#allocation3 + $0x32] sm:$0xff]  ;;  %v2105_v20 = vsel %vm592_vm2, %v2992_v7, 0 }
 0x1d7   : > { %v1983_v13 = vpack.c.bf16 %v1976_v11, %v1975_v10  ;;  %v1978_v15 = vld [vmem:[#allocation3 + $0x22] sm:$0xff]  ;;  %v1980_v17 = vld [vmem:[#allocation3 + $0x3a] sm:$0xff]  ;;  %v1981_v22 = vld [vmem:[#allocation3 + $0x4a] sm:$0xff] }
 0x1d8   : > { %v1984_v18 = vpack.c.bf16 %v1978_v15, %v1977_v14  ;;  %v4045_v19 = vpack.c.bf16 %v1980_v17, %v1979_v16  ;;  %v2997_v21 = vld [vmem:[%s4157_s5 + $0x8] sm:$0x3]  ;;  %v1982_v23 = vld [vmem:[#allocation3 + $0x52] sm:$0xff]  ;;  %v3002_v26 = vld [vmem:[%s4157_s5 + $0xa] sm:$0x3] }
 0x1d9   : > { %v1986_v24 = vpack.c.bf16 %v1982_v23, %v1981_v22  ;;  %v2207_v25 = vsel %vm592_vm2, %v2997_v21, 0  ;;  %v2084_v27 = vld [vmem:[#allocation3 + $0x60] sm:$0xff]  ;;  %v2085_v28 = vld [vmem:[#allocation3 + $0x68] sm:$0xff]  ;;  %v2309_v30 = vsel %vm592_vm2, %v3002_v26, 0  ;;  %v3017_v42 = vld [vmem:[%s4157_s5 + $0x10] sm:$0x3] }
 0x1da   : > { %v2089_v29 = vpack.c.bf16 %v2085_v28, %v2084_v27  ;;  %v3007_v31 = vld [vmem:[%s4157_s5 + $0xc] sm:$0x3]  ;;  %v2186_v32 = vld [vmem:[#allocation3 + $0x61] sm:$0xff]  ;;  %v3012_v36 = vld [vmem:[%s4157_s5 + $0xe] sm:$0x3]  ;;  %v2616_v46 = vsel %vm592_vm2, %v3017_v42, 0 }
 0x1db   : > { %v2187_v33 = vld [vmem:[#allocation3 + $0x69] sm:$0xff]  ;;  %v2412_v35 = vsel %vm592_vm2, %v3007_v31, 0  ;;  %v2514_v41 = vsel %vm592_vm2, %v3012_v36, 0  ;;  %v2391_v43 = vld [vmem:[#allocation3 + $0x78] sm:$0xff]  ;;  %v2392_v44 = vld [vmem:[#allocation3 + $0x80] sm:$0xff] }
 0x1dc   : > { %3272 = vmatmul.mubr.msk.bf16.gmra.mrb[16].mxu1 %vm484_vm1, %v4028_v62  ;;  %v2191_v34 = vpack.c.bf16 %v2187_v33, %v2186_v32  ;;  %v2288_v37 = vld [vmem:[#allocation3 + $0x62] sm:$0xff]  ;;  %v2289_v39 = vld [vmem:[#allocation3 + $0x6a] sm:$0xff]  ;;  %v2396_v45 = vpack.c.bf16 %v2392_v44, %v2391_v43  ;;  %v2493_v47 = vld [vmem:[#allocation3 + $0x79] sm:$0xff] }
 0x1dd   : > { %3277 = vmatprep.mubr.msk.bf16.mxu1 %vm484_vm1, %v1796_v63  ;;  %v2293_v40 = vpack.c.bf16 %v2289_v39, %v2288_v37  ;;  %v2494_v48 = vld [vmem:[#allocation3 + $0x81] sm:$0xff]  ;;  %v2693_v54 = vld [vmem:[%s3744_s18 + $0x10] sm:$0xff]  ;;  %v2694_v60 = vld [vmem:[%s3744_s18 + $0x18] sm:$0xff] }
 0x1de   : > { %v2498_v38 = vpack.c.bf16 %v2494_v48, %v2493_v47  ;;  %v2595_v49 = vld [vmem:[#allocation3 + $0x7a] sm:$0xff]  ;;  %v2596_v50 = vld [vmem:[#allocation3 + $0x82] sm:$0xff]  ;;  %v2697_v10 = vld [vmem:[%s3744_s18 + $0x30] sm:$0xff] }
 0x1df   : > { %v2600_v51 = vpack.c.bf16 %v2596_v50, %v2595_v49  ;;  %v2691_v57 = vld [vmem:[%s3744_s18] sm:$0xff]  ;;  %v2692_v0 = vld [vmem:[%s3744_s18 + $0x8] sm:$0xff]  ;;  %v2698_v16 = vld [vmem:[%s3744_s18 + $0x38] sm:$0xff] }
 0x1e4   : > { %3278 = vmatmul.mubr.msk.bf16.vlgmr.msra.gmra.mrb[12].mxu1 %vm484_vm1, %v1797_v4 }
 0x1e5   : > { %3286 = vmatpush3.bf16.msra.mxu1 %v2002_v6  ;;  %3281 = vmatprep.mubr.msk.bf16.mxu1 %vm484_vm1, %v4033_v5 }
 0x1e6   : > { %3530 = vmatprep.subr.msk.bf16.mxu1 %vm592_vm2, %v2992_v7 }
 0x1ec   : > { %3282 = vmatmul.mubr.msk.bf16.gmra.mrb[16].mxu1 %vm484_vm1, %v1799_v12 }
 0x1ed   : > { %3287 = vmatprep.mubr.msk.bf16.mxu1 %vm484_vm1, %v1983_v13  ;;  %v2695_v13 = vld [vmem:[%s3744_s18 + $0x20] sm:$0xff] }
 0x1f4   : > { %3288 = vmatmul.mubr.msk.bf16.vlgmr.msra.gmra.mrb[12].mxu1 %vm484_vm1, %v1984_v18 }
 0x1f5   : > { %3296 = vmatpush3.bf16.msra.mxu1 %v2105_v20  ;;  %3291 = vmatprep.mubr.msk.bf16.mxu1 %vm484_vm1, %v4045_v19  ;;  %v2696_v20 = vld [vmem:[%s3744_s18 + $0x28] sm:$0xff] }
 0x1f6   : > { %3531 = vmatprep.subr.msk.bf16.mxu1 %vm592_vm2, %v2997_v21 }
 0x1fc   : > { %3292 = vmatmul.mubr.msk.bf16.gmra.mrb[16].mxu1 %vm484_vm1, %v1986_v24 }
 0x1fd   : > { %3297 = vmatprep.mubr.msk.bf16.mxu1 %vm484_vm1, %v1797_v4 }
 0x204   : > { %3298 = vmatmul.mubr.msk.bf16.vlgmr.msra.gmra.mrb[12].mxu1 %vm484_vm1, %v4033_v5 }
 0x205   : > { %3306 = vmatpush3.bf16.msra.mxu1 %v2207_v25  ;;  %3301 = vmatprep.mubr.msk.bf16.mxu1 %vm484_vm1, %v1799_v12 }
 0x206   : > { %3532 = vmatprep.subr.msk.bf16.mxu1 %vm592_vm2, %v3002_v26 }
 0x20c   : > { %3302 = vmatmul.mubr.msk.bf16.gmra.mrb[16].mxu1 %vm484_vm1, %v2089_v29 }
 0x20d   : > { %3307 = vmatprep.mubr.msk.bf16.mxu1 %vm484_vm1, %v4013_v52  ;;  %v3022_v52 = vld [vmem:[%s4158_s6] ss:$0 sm:$0xff] }
 0x214   : > { %3308 = vmatmul.mubr.msk.bf16.vlgmr.msra.gmra.mrb[12].mxu1 %vm484_vm1, %v4018_v56 }
 0x215   : > { %3316 = vmatpush3.bf16.msra.mxu1 %v2309_v30  ;;  %3311 = vmatprep.mubr.msk.bf16.mxu1 %vm484_vm1, %v4028_v62 }
 0x216   : > { %3533 = vmatprep.subr.msk.bf16.mxu1 %vm592_vm2, %v3007_v31 }
 0x21c   : > { %3312 = vmatmul.mubr.msk.bf16.gmra.mrb[16].mxu1 %vm484_vm1, %v2191_v34 }
 0x21d   : > { %3317 = vmatprep.mubr.msk.bf16.mxu1 %vm484_vm1, %v1984_v18 }
 0x224   : > { %3318 = vmatmul.mubr.msk.bf16.vlgmr.msra.gmra.mrb[12].mxu1 %vm484_vm1, %v4045_v19 }
 0x225   : > { %3326 = vmatpush3.bf16.msra.mxu1 %v2412_v35  ;;  %3321 = vmatprep.mubr.msk.bf16.mxu1 %vm484_vm1, %v1986_v24 }
 0x226   : > { %3534 = vmatprep.subr.msk.bf16.mxu1 %vm592_vm2, %v3012_v36 }
 0x22c   : > { %3322 = vmatmul.mubr.msk.bf16.gmra.mrb[16].mxu1 %vm484_vm1, %v2293_v40 }
 0x22d   : > { %3327 = vmatprep.mubr.msk.bf16.mxu1 %vm484_vm1, %v4033_v5 }
 0x234   : > { %3328 = vmatmul.mubr.msk.bf16.vlgmr.msra.gmra.mrb[12].mxu1 %vm484_vm1, %v1799_v12 }
 0x235   : > { %3336 = vmatpush3.bf16.msra.mxu1 %v2514_v41  ;;  %3331 = vmatprep.mubr.msk.bf16.mxu1 %vm484_vm1, %v2089_v29 }
 0x236   : > { %3535 = vmatprep.subr.msk.bf16.mxu1 %vm592_vm2, %v3017_v42 }
 0x23c   : > { %3332 = vmatmul.mubr.msk.bf16.gmra.mrb[16].mxu1 %vm484_vm1, %v2396_v45 }
 0x23d   : > { %3337 = vmatprep.mubr.msk.bf16.mxu1 %vm484_vm1, %v4018_v56 }
 0x244   : > { %3338 = vmatmul.mubr.msk.bf16.vlgmr.msra.gmra.mrb[12].mxu1 %vm484_vm1, %v4028_v62 }
 0x245   : > { %3346 = vmatpush3.bf16.msra.mxu1 %v2616_v46  ;;  %3341 = vmatprep.mubr.msk.bf16.mxu1 %vm484_vm1, %v2191_v34 }
 0x24c   : > { %3342 = vmatmul.mubr.msk.bf16.gmra.mrb[16].mxu1 %vm484_vm1, %v2498_v38 }
 0x24d   : > { %3347 = vmatprep.mubr.msk.bf16.mxu1 %vm484_vm1, %v4045_v19 }
 0x254   : > { %3348 = vmatmul.mubr.msk.bf16.vlgmr.msra.gmra.mrb[12].mxu1 %vm484_vm1, %v1986_v24 }
 0x255   : > { %3351 = vmatprep.mubr.msk.bf16.mxu1 %vm484_vm1, %v2293_v40 }
 0x25c   : > { %3352 = vmatmul.mubr.msk.bf16.gmra.mrb[16].mxu1 %vm484_vm1, %v2600_v51 }
 0x327   : > { %v3349_v53 = vpop.f32.mrb[12].mxu1 }
 0x328   : > { %v2708_v55 = vadd.f32 %v3349_v53, %v3022_v52  ;;  %v2652_v56 = vpop.f32.mrb[13].mxu1 }
 0x329   : > { %v2706_v58 = vadd.f32 %v3022_v52, %v2652_v56  ;;  %v3350_v59 = vpop.f32.mrb[14].mxu1 }
 0x32a   : > { %v2716_v61 = vadd.f32 %v2708_v55, %v2693_v54  ;;  %v2709_v62 = vadd.f32 %v3350_v59, %v3022_v52  ;;  %v2655_v63 = vpop.f32.mrb[15].mxu1 }
 0x32b   : > { %v2714_v1 = vadd.f32 %v2706_v58, %v2691_v57  ;;  %v2707_v2 = vadd.f32 %v3022_v52, %v2655_v63 }
 0x32c   : > { %v2724_v3 = vmax.f32 %v2716_v61, 0.0  ;;  %v2717_v4 = vadd.f32 %v2709_v62, %v2694_v60 }
 0x32d   : > { %v2722_v5 = vmax.f32 %v2714_v1, 0.0  ;;  %v2715_v6 = vadd.f32 %v2707_v2, %v2692_v0 }
 0x32e   : > { %2732 = vst.msk [vmem:[%s3749_s21 + $0x10] sm:$0xff] %vm484_vm1, %v2724_v3  ;;  %v2725_v7 = vmax.f32 %v2717_v4, 0.0 }
 0x32f   : > { %2730 = vst.msk [vmem:[%s3749_s21] sm:$0xff] %vm484_vm1, %v2722_v5  ;;  %v2723_v8 = vmax.f32 %v2715_v6, 0.0  ;;  %v3353_v9 = vpop.f32.mrb[16].mxu1 }
 0x330   : > { %2733 = vst.msk [vmem:[%s3749_s21 + $0x18] sm:$0xff] %vm484_vm1, %v2725_v7  ;;  %v2712_v11 = vadd.f32 %v3353_v9, %v3022_v52  ;;  %v2668_v12 = vpop.f32.mrb[17].mxu1 }
 0x331   : > { %2731 = vst.msk [vmem:[%s3749_s21 + $0x8] sm:$0xff] %vm484_vm1, %v2723_v8  ;;  %v2710_v14 = vadd.f32 %v3022_v52, %v2668_v12  ;;  %v3354_v15 = vpop.f32.mrb[18].mxu1 }
 0x332   : > { %v2720_v17 = vadd.f32 %v2712_v11, %v2697_v10  ;;  %v2713_v18 = vadd.f32 %v3354_v15, %v3022_v52  ;;  %v2671_v19 = vpop.f32.mrb[19].mxu1 }
 0x333   : > { %v2718_v21 = vadd.f32 %v2710_v14, %v2695_v13  ;;  %v2711_v22 = vadd.f32 %v3022_v52, %v2671_v19 }
 0x334   : > { %v2728_v23 = vmax.f32 %v2720_v17, 0.0  ;;  %v2721_v24 = vadd.f32 %v2713_v18, %v2698_v16 }
 0x335   : > { %v2726_v25 = vmax.f32 %v2718_v21, 0.0  ;;  %v2719_v26 = vadd.f32 %v2711_v22, %v2696_v20 }
 0x336   : > { %2736 = vst.msk [vmem:[%s3749_s21 + $0x30] sm:$0xff] %vm484_vm1, %v2728_v23  ;;  %v2729_v27 = vmax.f32 %v2721_v24, 0.0 }
 0x337   : > { %2734 = vst.msk [vmem:[%s3749_s21 + $0x20] sm:$0xff] %vm484_vm1, %v2726_v25  ;;  %v2727_v28 = vmax.f32 %v2719_v26, 0.0 }
 0x338   : > { %2737 = vst.msk [vmem:[%s3749_s21 + $0x38] sm:$0xff] %vm484_vm1, %v2729_v27 }
 0x339   : > { %2735 = vst.msk [vmem:[%s3749_s21 + $0x28] sm:$0xff] %vm484_vm1, %v2727_v28 }
 0x33a PF: > { %s17_s28 = sadd.s32 1, %s3619_s28   ;;  %s4160_s24 = smov %s3611_s26 }
 0x33b   : > { %p14_p1 = scmp.ge.s32.totalorder %s17_s28, 10   ;;  %s4161_s25 = smov %s3615_s27 }
 0x33c   : > { %s4162_s26 = smov %s4165_s29  ;;  %s4163_s27 = smov %s4169_s30 }
 0x33d   :  { %16 = sbr.rel (!%p14_p1) target bundleno = 3 (0x3), region = 131 }

</bundles_post_ra>
